<compile_context>
chip_gen: v7x
topology: tpu7x:2x2x1
jax: 0.10.0
libtpu: 0.0.40
codegen_flags: <defaults>
</compile_context>

<pallas_src>
from functools import partial

import jax
import jax.numpy as jnp
from jax.experimental import pallas as pl
from jax.experimental.pallas import tpu as pltpu


def _round_up(x, m):
    return ((x + m - 1) // m) * m


# ----------------------------- Pallas kernel ------------------------------ #

def translator_mlp_kernel(x_ref, w1_ref, b1_ref, w2_ref, b2_ref,
                          wh_ref, bh_ref, slab_ref):
    """h1 = relu(x@W1+b1); h = h1 + relu(h1@W2+b2); slab = h@Wh + bh.

    Wh/bh are the packed lane-dense head  [ means (K*w_dim, padded to 128) |
    mixture logits (padded to 128) ].  The slab is streamed straight into the
    output ref (no re-slicing afterwards), so Mosaic can tile the head matmul
    over its N dimension and keep the live vreg set small (no spill epilogue).
    """
    x = x_ref[...]
    h1 = jnp.maximum(
        jnp.dot(x, w1_ref[...], preferred_element_type=jnp.float32) + b1_ref[...],
        0.0)
    h = h1 + jnp.maximum(
        jnp.dot(h1, w2_ref[...], preferred_element_type=jnp.float32) + b2_ref[...],
        0.0)
    slab_ref[...] = (
        jnp.dot(h, wh_ref[...], preferred_element_type=jnp.float32) + bh_ref[...])


# ----------------------------- JAX wrapper -------------------------------- #

def _default_num_batch_tiles():
    """One batch tile per TensorCore: v7x has 2 TCs/chip, v5e/v6e have 1."""
    try:
        kind = jax.devices()[0].device_kind.lower()
    except Exception:
        return 1
    return 2 if ("v7" in kind or "7x" in kind) else 1


def pack_head_params(params, num_mixtures, w_dim):
    """Pack w_layer | w_mixture_logits into one lane-dense head slab.

    Means occupy the first K*w_dim lanes (padded up to a 128 multiple only if
    needed); logits occupy a single 128-lane chunk.  Done ONCE per parameter
    set (hoisted out of the forward pass).
    """
    K = num_mixtures
    mpad = _round_up(K * w_dim, 128)
    lpad = _round_up(K, 128)
    wh = jnp.concatenate(
        [jnp.pad(params['ww'].astype(jnp.float32), ((0, 0), (0, mpad - K * w_dim))),
         jnp.pad(params['wm'].astype(jnp.float32), ((0, 0), (0, lpad - K)))],
        axis=1)
    bh = jnp.concatenate(
        [jnp.pad(params['bw'].astype(jnp.float32), ((0, 0), (0, mpad - K * w_dim))),
         jnp.pad(params['bm'].astype(jnp.float32), ((0, 0), (0, lpad - K)))],
        axis=1)
    return wh, bh, mpad, lpad


def build_translator_forward(params, *, num_mixtures, w_dim, num_batch_tiles=None):
    """Returns a jitted fn clip_latent -> (logits, means, stds, w).

    (logits, means, stds) are the MixtureSameFamily (w_gmm) parameters; w is
    the deterministic argmax-mixture mean (Translator deterministic branch).
    """
    K = num_mixtures
    wh, bh, mpad, lpad = pack_head_params(params, K, w_dim)   # hoisted, once
    slab_w = mpad + lpad
    if num_batch_tiles is None:
        num_batch_tiles = _default_num_batch_tiles()

    w1, b1 = params['w1'], params['b1']
    w2, b2 = params['w2'], params['b2']
    w_log_stds = params['w_log_stds']
    clip_dim = w1.shape[0]

    def _full_block(arr):
        # Constant-index full block: DMA'd once.  (Single-buffering via
        # pl.Buffered(1) was considered but the grid has <= 2 steps, so the
        # second weight buffer costs <1 MiB of VMEM -- not worth the risk.)
        n = arr.ndim
        return pl.BlockSpec(arr.shape, lambda i, _n=n: (0,) * _n)

    @jax.jit
    def forward(clip_latent):
        B = clip_latent.shape[0]
        # One tile per TensorCore; pad batch rows (discarded after the call).
        TB = _round_up(pl.cdiv(B, num_batch_tiles), 8)
        B_pad = TB * num_batch_tiles
        x = clip_latent.astype(jnp.float32)
        if B_pad != B:
            x = jnp.pad(x, ((0, B_pad - B), (0, 0)))

        slab = pl.pallas_call(
            translator_mlp_kernel,
            out_shape=jax.ShapeDtypeStruct((B_pad, slab_w), jnp.float32),
            grid=(num_batch_tiles,),
            in_specs=[pl.BlockSpec((TB, clip_dim), lambda i: (i, 0)),
                      _full_block(w1), _full_block(b1),
                      _full_block(w2), _full_block(b2),
                      _full_block(wh), _full_block(bh)],
            out_specs=pl.BlockSpec((TB, slab_w), lambda i: (i, 0)),
            compiler_params=pltpu.CompilerParams(
                dimension_semantics=("parallel",)),
        )(x, w1, b1, w2, b2, wh, bh)

        # unpack the lane-dense slab + deterministic GMM branch (tiny, fused)
        slab = slab[:B]
        means = slab[:, :K * w_dim].reshape(B, K, w_dim)
        logits = slab[:, mpad:mpad + K]
        idx = jnp.argmax(logits, axis=1)
        w = jnp.take_along_axis(means, idx[:, None, None], axis=1)[:, 0, :]
        stds = jnp.broadcast_to(jnp.exp(w_log_stds) + 1e-6, (B, K, w_dim))
        return logits, means, stds, w

    return forward


def model_forward_clip_latent(x, translator_forward_fn):
    """Model.forward(x, x_type='clip_latent', return_after_translator=True,
    add_clip_noise=False) with with_gmm=True.  Returns
    (clip_latent, w_gmm_params, w)."""
    clip_latent = x
    logits, means, stds, w = translator_forward_fn(clip_latent)
    # TODO(synk): CLIP text/image encoders, StyleGAN-XL synthesis G(w), BLIP
    # captioner and DiffAugment require external pretrained checkpoints and are
    # not implemented here.
    return clip_latent, (logits, means, stds), w


# -------------------------- parameter construction ------------------------ #

def init_translator_params(key, clip_dim, w_dim, num_mixtures):
    """Deterministic init mimicking nn.Linear default U(-1/sqrt(fan_in), ...)."""
    hid = 4 * clip_dim

    def linear(k, fan_in, fan_out):
        kw, kb = jax.random.split(k)
        bound = 1.0 / jnp.sqrt(fan_in)
        W = jax.random.uniform(kw, (fan_in, fan_out), jnp.float32, -bound, bound)
        b = jax.random.uniform(kb, (1, fan_out), jnp.float32, -bound, bound)
        return W, b

    k1, k2, k3, k4 = jax.random.split(key, 4)
    w1, b1 = linear(k1, clip_dim, hid)                    # shared1
    w2, b2 = linear(k2, hid, hid)                         # shared2
    ww, bw = linear(k3, hid, num_mixtures * w_dim)        # w_layer
    wm, bm = linear(k4, hid, num_mixtures)                # w_mixture_logits
    w_log_stds = jnp.log(jnp.ones((1, 1, w_dim), jnp.float32) * 0.01)
    return dict(w1=w1, b1=b1, w2=w2, b2=b2, ww=ww, bw=bw, wm=wm, bm=bm,
                w_log_stds=w_log_stds)


# -------------------------- pure-JAX reference ----------------------------- #

def reference_forward(x, p, num_mixtures, w_dim):
    h1 = jnp.maximum(x @ p['w1'] + p['b1'], 0.0)
    h = h1 + jnp.maximum(h1 @ p['w2'] + p['b2'], 0.0)
    means = (h @ p['ww'] + p['bw']).reshape(x.shape[0], num_mixtures, w_dim)
    logits = h @ p['wm'] + p['bm']
    idx = jnp.argmax(logits, axis=1)
    w = jnp.take_along_axis(means, idx[:, None, None], axis=1)[:, 0, :]
    return logits, means, w


# --------------------------------- main ------------------------------------ #

if __name__ == "__main__":
    # Batched translator: B=256 fills the MXU rows; grid = 1 tile on
    # single-TensorCore chips (v5e/v6e), 2 parallel tiles on v7x.
    B, CLIP_DIM, W_DIM, K = 256, 32, 64, 4

    key = jax.random.PRNGKey(0)
    kx, kp = jax.random.split(key)
    x = jax.random.normal(kx, (B, CLIP_DIM), jnp.float32)          # clip_latent
    params = init_translator_params(kp, CLIP_DIM, W_DIM, K)

    translator_fn = build_translator_forward(params, num_mixtures=K, w_dim=W_DIM)
    clip_latent, (logits, means, stds), w = model_forward_clip_latent(x, translator_fn)
    jax.block_until_ready((clip_latent, logits, means, stds, w))

    # correctness check vs pure-JAX reference
    ref_logits, ref_means, ref_w = reference_forward(x, params, K, W_DIM)
    assert jnp.allclose(logits, ref_logits, rtol=1e-4, atol=1e-4)
    assert jnp.allclose(means, ref_means, rtol=1e-4, atol=1e-4)
    assert jnp.allclose(w, ref_w, rtol=1e-4, atol=1e-4)
    assert stds.shape == (B, K, W_DIM)

    print("KERNEL_OK")
</pallas_src>

<mosaic_0001>
module attributes {stable_mosaic.version = 11 : i64} {
  func.func @translator_mlp_kernel(%arg0: i32, %arg1: memref<256x32xf32, #tpu.memory_space<vmem>>, %arg2: memref<32x128xf32, #tpu.memory_space<vmem>>, %arg3: memref<1x128xf32, #tpu.memory_space<vmem>>, %arg4: memref<128x128xf32, #tpu.memory_space<vmem>>, %arg5: memref<1x128xf32, #tpu.memory_space<vmem>>, %arg6: memref<128x384xf32, #tpu.memory_space<vmem>>, %arg7: memref<1x384xf32, #tpu.memory_space<vmem>>, %arg8: memref<256x384xf32, #tpu.memory_space<vmem>>) attributes {dimension_semantics = [#tpu.dimension_semantics<parallel>], iteration_bounds = array<i64: 1>, scalar_prefetch = 0 : i64, scratch_operands = 0 : i64, tpu.core_type = #tpu.core_type<tc>, window_params = [{transform_indices = @transform_0, window_bounds = array<i64: 256, 32>}, {pipeline_mode = #tpu.pipeline_mode<synchronous>, transform_indices = @transform_1, window_bounds = array<i64: 32, 128>}, {pipeline_mode = #tpu.pipeline_mode<synchronous>, transform_indices = @transform_2, window_bounds = array<i64: 1, 128>}, {pipeline_mode = #tpu.pipeline_mode<synchronous>, transform_indices = @transform_3, window_bounds = array<i64: 128, 128>}, {pipeline_mode = #tpu.pipeline_mode<synchronous>, transform_indices = @transform_4, window_bounds = array<i64: 1, 128>}, {pipeline_mode = #tpu.pipeline_mode<synchronous>, transform_indices = @transform_5, window_bounds = array<i64: 128, 384>}, {pipeline_mode = #tpu.pipeline_mode<synchronous>, transform_indices = @transform_6, window_bounds = array<i64: 1, 384>}, {transform_indices = @transform_7, window_bounds = array<i64: 256, 384>}]} {
    %c0 = arith.constant 0 : index
    %c0_0 = arith.constant 0 : index
    %0 = vector.load %arg1[%c0, %c0_0] : memref<256x32xf32, #tpu.memory_space<vmem>>, vector<256x32xf32>
    %c0_1 = arith.constant 0 : index
    %c0_2 = arith.constant 0 : index
    %1 = vector.load %arg2[%c0_1, %c0_2] : memref<32x128xf32, #tpu.memory_space<vmem>>, vector<32x128xf32>
    %cst = arith.constant dense<0.000000e+00> : vector<256x128xf32>
    %2 = tpu.matmul %0, %1, %cst {dimension_numbers = #tpu.dot_dimension_numbers<[1], [0], [0], [1], [0, 0, 1, 1], [], []>} : vector<256x32xf32>, vector<32x128xf32>, vector<256x128xf32> -> vector<256x128xf32>
    %c0_3 = arith.constant 0 : index
    %c0_4 = arith.constant 0 : index
    %3 = vector.load %arg3[%c0_3, %c0_4] : memref<1x128xf32, #tpu.memory_space<vmem>>, vector<1x128xf32>
    %4 = vector.broadcast %3 : vector<1x128xf32> to vector<256x128xf32>
    %5 = arith.addf %2, %4 : vector<256x128xf32>
    %cst_5 = arith.constant 0.000000e+00 : f32
    %6 = vector.broadcast %cst_5 : f32 to vector<256x128xf32>
    %7 = arith.maximumf %5, %6 : vector<256x128xf32>
    %c0_6 = arith.constant 0 : index
    %c0_7 = arith.constant 0 : index
    %8 = vector.load %arg4[%c0_6, %c0_7] : memref<128x128xf32, #tpu.memory_space<vmem>>, vector<128x128xf32>
    %cst_8 = arith.constant dense<0.000000e+00> : vector<256x128xf32>
    %9 = tpu.matmul %7, %8, %cst_8 {dimension_numbers = #tpu.dot_dimension_numbers<[1], [0], [0], [1], [0, 0, 1, 1], [], []>} : vector<256x128xf32>, vector<128x128xf32>, vector<256x128xf32> -> vector<256x128xf32>
    %c0_9 = arith.constant 0 : index
    %c0_10 = arith.constant 0 : index
    %10 = vector.load %arg5[%c0_9, %c0_10] : memref<1x128xf32, #tpu.memory_space<vmem>>, vector<1x128xf32>
    %11 = vector.broadcast %10 : vector<1x128xf32> to vector<256x128xf32>
    %12 = arith.addf %9, %11 : vector<256x128xf32>
    %cst_11 = arith.constant 0.000000e+00 : f32
    %13 = vector.broadcast %cst_11 : f32 to vector<256x128xf32>
    %14 = arith.maximumf %12, %13 : vector<256x128xf32>
    %15 = arith.addf %7, %14 : vector<256x128xf32>
    %c0_12 = arith.constant 0 : index
    %c0_13 = arith.constant 0 : index
    %16 = vector.load %arg6[%c0_12, %c0_13] : memref<128x384xf32, #tpu.memory_space<vmem>>, vector<128x384xf32>
    %cst_14 = arith.constant dense<0.000000e+00> : vector<256x384xf32>
    %17 = tpu.matmul %15, %16, %cst_14 {dimension_numbers = #tpu.dot_dimension_numbers<[1], [0], [0], [1], [0, 0, 1, 1], [], []>} : vector<256x128xf32>, vector<128x384xf32>, vector<256x384xf32> -> vector<256x384xf32>
    %c0_15 = arith.constant 0 : index
    %c0_16 = arith.constant 0 : index
    %18 = vector.load %arg7[%c0_15, %c0_16] : memref<1x384xf32, #tpu.memory_space<vmem>>, vector<1x384xf32>
    %19 = vector.broadcast %18 : vector<1x384xf32> to vector<256x384xf32>
    %20 = arith.addf %17, %19 : vector<256x384xf32>
    %c0_17 = arith.constant 0 : index
    %c0_18 = arith.constant 0 : index
    %21 = vector.load %arg8[%c0_17, %c0_18] : memref<256x384xf32, #tpu.memory_space<vmem>>, vector<256x384xf32>
    tpu.vector_store %arg8[%c0_17, %c0_18], %20 {strides = array<i32>} : memref<256x384xf32, #tpu.memory_space<vmem>>, vector<256x384xf32>,
    return
  }
  func.func @transform_0(%arg0: i32) -> (i32, i32) {
    %c0_i32 = arith.constant 0 : i32
    %c0_i32_0 = arith.constant 0 : i32
    return %arg0, %c0_i32 : i32, i32
  }
  func.func @transform_1(%arg0: i32) -> (i32, i32) {
    %c0_i32 = arith.constant 0 : i32
    %c0_i32_0 = arith.constant 0 : i32
    %c0_i32_1 = arith.constant 0 : i32
    return %c0_i32, %c0_i32_0 : i32, i32
  }
  func.func @transform_2(%arg0: i32) -> (i32, i32) {
    %c0_i32 = arith.constant 0 : i32
    %c0_i32_0 = arith.constant 0 : i32
    %c0_i32_1 = arith.constant 0 : i32
    return %c0_i32, %c0_i32_0 : i32, i32
  }
  func.func @transform_3(%arg0: i32) -> (i32, i32) {
    %c0_i32 = arith.constant 0 : i32
    %c0_i32_0 = arith.constant 0 : i32
    %c0_i32_1 = arith.constant 0 : i32
    return %c0_i32, %c0_i32_0 : i32, i32
  }
  func.func @transform_4(%arg0: i32) -> (i32, i32) {
    %c0_i32 = arith.constant 0 : i32
    %c0_i32_0 = arith.constant 0 : i32
    %c0_i32_1 = arith.constant 0 : i32
    return %c0_i32, %c0_i32_0 : i32, i32
  }
  func.func @transform_5(%arg0: i32) -> (i32, i32) {
    %c0_i32 = arith.constant 0 : i32
    %c0_i32_0 = arith.constant 0 : i32
    %c0_i32_1 = arith.constant 0 : i32
    return %c0_i32, %c0_i32_0 : i32, i32
  }
  func.func @transform_6(%arg0: i32) -> (i32, i32) {
    %c0_i32 = arith.constant 0 : i32
    %c0_i32_0 = arith.constant 0 : i32
    %c0_i32_1 = arith.constant 0 : i32
    return %c0_i32, %c0_i32_0 : i32, i32
  }
  func.func @transform_7(%arg0: i32) -> (i32, i32) {
    %c0_i32 = arith.constant 0 : i32
    %c0_i32_0 = arith.constant 0 : i32
    return %arg0, %c0_i32 : i32, i32
  }
}

</mosaic_0001>

<bundles_post_ra>
// kernel: forward.1
= control target key start
LH: loop header
LB: loop body
LE: loop exit
PB: predicated region body
PF: predicated region fallthrough
CT: control target
= control target key end

     0   :  { %12 = vsyncpa [#allocation3], 0  ;;  %s1915_s24 = smov [#allocation2]   ;;  %s2971_s0 = inlined_call_operand.vmem [shape: f32[256,32], index: 0, kind: input, shape index: {}]   ;;  %s2972_s1 = inlined_call_operand.vmem [shape: f32[32,128], index: 1, kind: input, shape index: {}]   ;;  %s2973_s2 = inlined_call_operand.vmem [shape: f32[1,128], index: 2, kind: input, shape index: {}]   ;;  %s2974_s3 = inlined_call_operand.vmem [shape: f32[128,128], index: 3, kind: input, shape index: {}]   ;;  %s2975_s4 = inlined_call_operand.vmem [shape: f32[1,128], index: 4, kind: input, shape index: {}]   ;;  %s2976_s5 = inlined_call_operand.hbm [shape: f32[128,384], index: 5, kind: input, shape index: {}]   ;;  %s2977_s6 = inlined_call_operand.vmem [shape: f32[1,384], index: 6, kind: input, shape index: {}]   ;;  %s2978_s7 = inlined_call_operand.vmem [shape: f32[256,384], index: 7, kind: output, shape index: {}]  }
   0x1   :  { %s28_s25 = sshll.u32 %s1915_s24, 4  ;;  %s1891_s28 = scalar_lea.hbm %s2976_s5, 6144  ;;  %s29_s25 = int_to_ptr.vmem [resolvable:$true] %s28_s25 }
   0x2   :  { %p1892_p0 = scmp.ne.s32.totalorder %s2976_s5, %s1891_s28  ;;  %p1895_p1 = scmp.lt.u32.totalorder %s1891_s28, %s2976_s5 }
   0x4   :  { %p1897_p2 = pnand %p1895_p1, %p1892_p0 }
   0x6   :  { %1900 = shalt.err (!%p1897_p2)
}
   0x7   :  { %s1901_s10 = scalar_lea.vmem %s29_s25, 6144  ;;  %p1906_p4 = scmp.lt.s32.totalorder %s29_s25, %s29_s25 }
   0x8   :  { %p1902_p3 = scmp.ne.s32.totalorder %s29_s25, %s1901_s10  ;;  %p1907_p5 = scmp.lt.s32.totalorder %s1901_s10, %s1901_s10 }
   0xa   :  { %p1908_p6 = por %p1907_p5, %p1906_p4 }
   0xc   :  { %p1909_p7 = pnand %p1908_p6, %p1902_p3 }
   0xe   :  { %1912 = shalt.err (!%p1909_p7)
}
   0xf   :  { %s1916_s11 = smov 384   ;;  %s1917_s12 = smov 24  }
  0x10   :  { %34 = dma.hbm_to_vmem [thread:$0]  %s2976_s5, 6144, %s29_s25, [#allocation3], %s1916_s11, %s1916_s11, %s1917_s12  }
  0x11   :  { %1913 = dma.done.wait [#allocation3], 6144  }
  0x12   :  { %1914 = vsyncadd [#allocation3], 4294961152  ;;  %vm83_vm0 = vcmask 261120   ;;  %v72_v0 = vld [vmem:[%s2972_s1] sm:$0xff]  ;;  %v73_v1 = vld [vmem:[%s2972_s1 + $0x8] sm:$0xff] }
  0x13   :  { %v74_v2 = vld [vmem:[%s2972_s1 + $0x10] sm:$0xff]  ;;  %v1779_v3 = vpack.c.bf16 %v73_v1, %v72_v0  ;;  %v75_v4 = vld [vmem:[%s2972_s1 + $0x18] sm:$0xff]  ;;  %v40_v5 = vld [vmem:[%s2971_s0] sm:$0xff] }
  0x14   :  { %v1783_v6 = vpack.c.bf16 %v75_v4, %v74_v2  ;;  %1571 = vmatprep.mubr.msk.f32.mxu0 %vm83_vm0, %v40_v5  ;;  %v56_v7 = vld [vmem:[%s2971_s0 + $0x80] sm:$0xff]  ;;  %v41_v8 = vld [vmem:[%s2971_s0 + $0x8] sm:$0xff]  ;;  %v42_v10 = vld [vmem:[%s2971_s0 + $0x10] sm:$0xff] }
  0x15   :  { %1780 = vmatprep.subr.bf16.mxu0 %v1779_v3  ;;  %1883 = vmatprep.subr.bf16.mxu1 %v1779_v3  ;;  %v57_v9 = vld [vmem:[%s2971_s0 + $0x88] sm:$0xff]  ;;  %v58_v11 = vld [vmem:[%s2971_s0 + $0x90] sm:$0xff]  ;;  %v43_v12 = vld [vmem:[%s2971_s0 + $0x18] sm:$0xff] }
  0x16   :  { %1782 = vmatpush3.bf16.msra.mxu0 %v1779_v3  ;;  %1885 = vmatpush3.bf16.msra.mxu1 %v1779_v3  ;;  %v59_v13 = vld [vmem:[%s2971_s0 + $0x98] sm:$0xff]  ;;  %v437_v14 = vld [vmem:[%s2974_s3] sm:$0xff]  ;;  %v438_v15 = vld [vmem:[%s2974_s3 + $0x8] sm:$0xff] }
  0x17   :  { %1784 = vmatprep.subr.bf16.mxu0 %v1783_v6  ;;  %1884 = vmatprep.subr.bf16.mxu1 %v1783_v6  ;;  %v44_v16 = vld [vmem:[%s2971_s0 + $0x20] sm:$0xff]  ;;  %v1787_v18 = vpack.c.bf16 %v438_v15, %v437_v14  ;;  %v439_v19 = vld [vmem:[%s2974_s3 + $0x10] sm:$0xff]  ;;  %v440_v20 = vld [vmem:[%s2974_s3 + $0x18] sm:$0xff] }
  0x18   :  { %1595 = vmatprep.mubr.msk.f32.mxu1 %vm83_vm0, %v56_v7  ;;  %v60_v17 = vld [vmem:[%s2971_s0 + $0xa0] sm:$0xff]  ;;  %v45_v21 = vld [vmem:[%s2971_s0 + $0x28] sm:$0xff]  ;;  %v46_v23 = vld [vmem:[%s2971_s0 + $0x30] sm:$0xff]  ;;  %v1791_v25 = vpack.c.bf16 %v440_v20, %v439_v19 }
  0x19   :  { %v61_v22 = vld [vmem:[%s2971_s0 + $0xa8] sm:$0xff]  ;;  %v62_v24 = vld [vmem:[%s2971_s0 + $0xb0] sm:$0xff]  ;;  %v441_v26 = vld [vmem:[%s2974_s3 + $0x20] sm:$0xff] }
  0x1a   :  { %1786 = vmatpush3.bf16.msra.mxu0 %v1783_v6  ;;  %1886 = vmatpush3.bf16.msra.mxu1 %v1783_v6  ;;  %v442_v27 = vld [vmem:[%s2974_s3 + $0x28] sm:$0xff]  ;;  %v47_v28 = vld [vmem:[%s2971_s0 + $0x38] sm:$0xff]  ;;  %v48_v30 = vld [vmem:[%s2971_s0 + $0x40] sm:$0xff] }
  0x1b   :  { %1788 = vmatprep.subr.bf16.mxu1 %v1787_v18  ;;  %v63_v29 = vld [vmem:[%s2971_s0 + $0xb8] sm:$0xff]  ;;  %v64_v31 = vld [vmem:[%s2971_s0 + $0xc0] sm:$0xff]  ;;  %v1795_v32 = vpack.c.bf16 %v442_v27, %v441_v26  ;;  %v443_v33 = vld [vmem:[%s2974_s3 + $0x30] sm:$0xff] }
  0x1c   :  { %v444_v34 = vld [vmem:[%s2974_s3 + $0x38] sm:$0xff]  ;;  %v49_v35 = vld [vmem:[%s2971_s0 + $0x48] sm:$0xff]  ;;  %v50_v37 = vld [vmem:[%s2971_s0 + $0x50] sm:$0xff] }
  0x1d   :  { %1572 = vmatmul.mubr.msk.f32.vlgmr.msra.gmra.mrb[0].mxu0 %vm83_vm0, %v41_v8  ;;  %1596 = vmatmul.mubr.msk.f32.vlgmr.msra.gmra.mrb[0].mxu1 %vm83_vm0, %v57_v9  ;;  %v65_v36 = vld [vmem:[%s2971_s0 + $0xc8] sm:$0xff]  ;;  %v66_v38 = vld [vmem:[%s2971_s0 + $0xd0] sm:$0xff]  ;;  %v1799_v39 = vpack.c.bf16 %v444_v34, %v443_v33  ;;  %v445_v40 = vld [vmem:[%s2974_s3 + $0x40] sm:$0xff] }
  0x1e   :  { %1574 = vmatprep.mubr.msk.f32.mxu0 %vm83_vm0, %v42_v10  ;;  %1598 = vmatprep.mubr.msk.f32.mxu1 %vm83_vm0, %v58_v11  ;;  %v446_v41 = vld [vmem:[%s2974_s3 + $0x48] sm:$0xff]  ;;  %v51_v42 = vld [vmem:[%s2971_s0 + $0x58] sm:$0xff]  ;;  %v52_v44 = vld [vmem:[%s2971_s0 + $0x60] sm:$0xff] }
  0x1f   :  { %1790 = vmatpush3.bf16.msra.mxu1 %v1787_v18  ;;  %v67_v43 = vld [vmem:[%s2971_s0 + $0xd8] sm:$0xff]  ;;  %v68_v45 = vld [vmem:[%s2971_s0 + $0xe0] sm:$0xff]  ;;  %v1803_v46 = vpack.c.bf16 %v446_v41, %v445_v40  ;;  %v447_v47 = vld [vmem:[%s2974_s3 + $0x50] sm:$0xff] }
  0x20   :  { %1792 = vmatprep.subr.bf16.mxu1 %v1791_v25  ;;  %v448_v48 = vld [vmem:[%s2974_s3 + $0x58] sm:$0xff]  ;;  %v53_v49 = vld [vmem:[%s2971_s0 + $0x68] sm:$0xff]  ;;  %v54_v50 = vld [vmem:[%s2971_s0 + $0x70] sm:$0xff] }
  0x21   :  { %1575 = vmatmul.mubr.msk.f32.gmra.mrb[2].mxu0 %vm83_vm0, %v43_v12  ;;  %1599 = vmatmul.mubr.msk.f32.gmra.mrb[2].mxu1 %vm83_vm0, %v59_v13  ;;  %v69_v51 = vld [vmem:[%s2971_s0 + $0xe8] sm:$0xff]  ;;  %v70_v52 = vld [vmem:[%s2971_s0 + $0xf0] sm:$0xff]  ;;  %v1807_v53 = vpack.c.bf16 %v448_v48, %v447_v47  ;;  %v449_v54 = vld [vmem:[%s2974_s3 + $0x60] sm:$0xff] }
  0x22   :  { %1577 = vmatprep.mubr.msk.f32.mxu0 %vm83_vm0, %v44_v16  ;;  %1601 = vmatprep.mubr.msk.f32.mxu1 %vm83_vm0, %v60_v17  ;;  %v450_v55 = vld [vmem:[%s2974_s3 + $0x68] sm:$0xff]  ;;  %v55_v56 = vld [vmem:[%s2971_s0 + $0x78] sm:$0xff]  ;;  %v451_v59 = vld [vmem:[%s2974_s3 + $0x70] sm:$0xff] }
  0x23   :  { %1794 = vmatpush3.bf16.msra.mxu1 %v1791_v25  ;;  %v71_v57 = vld [vmem:[%s2971_s0 + $0xf8] sm:$0xff]  ;;  %v1811_v58 = vpack.c.bf16 %v450_v55, %v449_v54  ;;  %v750_v62 = vld [vmem:[#allocation2 + $0x8] sm:$0xff]  ;;  %v753_v63 = vld [vmem:[#allocation2 + $0x20] sm:$0xff] }
  0x24   :  { %1796 = vmatprep.subr.bf16.mxu1 %v1795_v32  ;;  %v452_v60 = vld [vmem:[%s2974_s3 + $0x78] sm:$0xff]  ;;  %v749_v0 = vld [vmem:[#allocation2] sm:$0xff]  ;;  %v1819_v1 = vpack.c.bf16 %v753_v63, %v750_v62  ;;  %v751_v3 = vld [vmem:[#allocation2 + $0x10] sm:$0xff] }
  0x25   :  { %1578 = vmatmul.mubr.msk.f32.gmra.mrb[4].mxu0 %vm83_vm0, %v45_v21  ;;  %1602 = vmatmul.mubr.msk.f32.gmra.mrb[4].mxu1 %vm83_vm0, %v61_v22  ;;  %v1815_v61 = vpack.c.bf16 %v452_v60, %v451_v59  ;;  %v752_v2 = vld [vmem:[#allocation2 + $0x18] sm:$0xff]  ;;  %v754_v4 = vld [vmem:[#allocation2 + $0x28] sm:$0xff]  ;;  %v759_v8 = vld [vmem:[#allocation2 + $0x50] sm:$0xff] }
  0x26   :  { %1580 = vmatprep.mubr.msk.f32.mxu0 %vm83_vm0, %v46_v23  ;;  %1604 = vmatprep.mubr.msk.f32.mxu1 %vm83_vm0, %v62_v24  ;;  %v1821_v5 = vpack.c.bf16 %v752_v2, %v749_v0  ;;  %v2159_v6 = vpack.c.bf16 %v754_v4, %v751_v3  ;;  %v756_v7 = vld [vmem:[#allocation2 + $0x38] sm:$0xff]  ;;  %v755_v9 = vld [vmem:[#allocation2 + $0x30] sm:$0xff]  ;;  %v758_v11 = vld [vmem:[#allocation2 + $0x48] sm:$0xff] }
  0x27   :  { %1798 = vmatpush3.bf16.msra.mxu1 %v1795_v32  ;;  %1820 = vmatprep.subr.bf16.mxu0 %v1819_v1  ;;  %v1823_v10 = vpack.c.bf16 %v759_v8, %v756_v7  ;;  %v1825_v12 = vpack.c.bf16 %v758_v11, %v755_v9  ;;  %v762_v13 = vld [vmem:[#allocation2 + $0x68] sm:$0xff]  ;;  %v765_v14 = vld [vmem:[#allocation2 + $0x80] sm:$0xff]  ;;  %v764_v17 = vld [vmem:[#allocation2 + $0x78] sm:$0xff] }
  0x28   :  { %1800 = vmatprep.subr.bf16.mxu1 %v1799_v39  ;;  %1822 = vmatpush1.bf16.msra.mxu0 %v1821_v5  ;;  %v1827_v15 = vpack.c.bf16 %v765_v14, %v762_v13  ;;  %v761_v16 = vld [vmem:[#allocation2 + $0x60] sm:$0xff]  ;;  %v768_v18 = vld [vmem:[#allocation2 + $0x98] sm:$0xff]  ;;  %v771_v19 = vld [vmem:[#allocation2 + $0xb0] sm:$0xff] }
  0x29   :  { %1581 = vmatmul.mubr.msk.f32.gmra.mrb[6].mxu0 %vm83_vm0, %v47_v28  ;;  %1605 = vmatmul.mubr.msk.f32.gmra.mrb[6].mxu1 %vm83_vm0, %v63_v29  ;;  %v1829_v20 = vpack.c.bf16 %v764_v17, %v761_v16  ;;  %v1831_v21 = vpack.c.bf16 %v771_v19, %v768_v18  ;;  %v767_v22 = vld [vmem:[#allocation2 + $0x90] sm:$0xff]  ;;  %v770_v23 = vld [vmem:[#allocation2 + $0xa8] sm:$0xff]  ;;  %v777_v25 = vld [vmem:[#allocation2 + $0xe0] sm:$0xff] }
  0x2a   :  { %1583 = vmatprep.mubr.msk.f32.mxu0 %vm83_vm0, %v48_v30  ;;  %1607 = vmatprep.mubr.msk.f32.mxu1 %vm83_vm0, %v64_v31  ;;  %v774_v24 = vld [vmem:[#allocation2 + $0xc8] sm:$0xff]  ;;  %v1833_v26 = vpack.c.bf16 %v770_v23, %v767_v22  ;;  %v773_v28 = vld [vmem:[#allocation2 + $0xc0] sm:$0xff]  ;;  %v776_v29 = vld [vmem:[#allocation2 + $0xd8] sm:$0xff] }
  0x2b   :  { %1802 = vmatpush3.bf16.msra.mxu1 %v1799_v39  ;;  %1824 = vmatprep.subr.bf16.mxu0 %v1823_v10  ;;  %v1835_v27 = vpack.c.bf16 %v777_v25, %v774_v24  ;;  %v780_v30 = vld [vmem:[#allocation2 + $0xf8] sm:$0xff]  ;;  %v783_v31 = vld [vmem:[#allocation2 + $0x110] sm:$0xff]  ;;  %v1837_v32 = vpack.c.bf16 %v776_v29, %v773_v28  ;;  %v2165_v40 = vld [vmem:[%s2973_s2] ss:$0 sm:$0xff] }
  0x2c   :  { %1804 = vmatprep.subr.bf16.mxu1 %v1803_v46  ;;  %1826 = vmatpush1.bf16.msra.mxu0 %v1825_v12  ;;  %v1839_v33 = vpack.c.bf16 %v783_v31, %v780_v30  ;;  %v779_v34 = vld [vmem:[#allocation2 + $0xf0] sm:$0xff]  ;;  %v757_v47 = vld [vmem:[#allocation2 + $0x40] sm:$0xff]  ;;  %v760_v48 = vld [vmem:[#allocation2 + $0x58] sm:$0xff] }
  0x2d   :  { %1584 = vmatmul.mubr.msk.f32.gmra.mrb[8].mxu0 %vm83_vm0, %v49_v35  ;;  %1608 = vmatmul.mubr.msk.f32.gmra.mrb[8].mxu1 %vm83_vm0, %v65_v36  ;;  %v782_v35 = vld [vmem:[#allocation2 + $0x108] sm:$0xff]  ;;  %v769_v5 = vld [vmem:[#allocation2 + $0xa0] sm:$0xff]  ;;  %v772_v7 = vld [vmem:[#allocation2 + $0xb8] sm:$0xff] }
  0x2e   :  { %1586 = vmatprep.mubr.msk.f32.mxu0 %vm83_vm0, %v50_v37  ;;  %1610 = vmatprep.mubr.msk.f32.mxu1 %vm83_vm0, %v66_v38  ;;  %v786_v36 = vld [vmem:[#allocation2 + $0x128] sm:$0xff]  ;;  %v789_v37 = vld [vmem:[#allocation2 + $0x140] sm:$0xff]  ;;  %v1841_v38 = vpack.c.bf16 %v782_v35, %v779_v34  ;;  %v1863_v14 = vpack.c.bf16 %v772_v7, %v769_v5  ;;  %v775_v16 = vld [vmem:[#allocation2 + $0xd0] sm:$0xff] }
  0x2f   :  { %1806 = vmatpush3.bf16.msra.mxu1 %v1803_v46  ;;  %1828 = vmatprep.subr.bf16.mxu0 %v1827_v15  ;;  %v1843_v39 = vpack.c.bf16 %v789_v37, %v786_v36  ;;  %v766_v59 = vld [vmem:[#allocation2 + $0x88] sm:$0xff]  ;;  %v784_v28 = vld [vmem:[#allocation2 + $0x118] sm:$0xff] }
  0x30   :  { %1808 = vmatprep.subr.bf16.mxu1 %v1807_v53  ;;  %1830 = vmatpush1.bf16.msra.mxu0 %v1829_v20  ;;  %v778_v17 = vld [vmem:[#allocation2 + $0xe8] sm:$0xff] }
  0x31   :  { %1587 = vmatmul.mubr.msk.f32.gmra.mrb[10].mxu0 %vm83_vm0, %v51_v42  ;;  %1611 = vmatmul.mubr.msk.f32.gmra.mrb[10].mxu1 %vm83_vm0, %v67_v43  ;;  %v1867_v25 = vpack.c.bf16 %v778_v17, %v775_v16 }
  0x32   :  { %1589 = vmatprep.mubr.msk.f32.mxu0 %vm83_vm0, %v52_v44  ;;  %1613 = vmatprep.mubr.msk.f32.mxu1 %vm83_vm0, %v68_v45 }
  0x33   :  { %1810 = vmatpush3.bf16.msra.mxu1 %v1807_v53  ;;  %1832 = vmatprep.subr.bf16.mxu0 %v1831_v21 }
  0x34   :  { %1812 = vmatprep.subr.bf16.mxu1 %v1811_v58  ;;  %1834 = vmatpush1.bf16.msra.mxu0 %v1833_v26 }
  0x35   :  { %1590 = vmatmul.mubr.msk.f32.gmra.mrb[12].mxu0 %vm83_vm0, %v53_v49  ;;  %1614 = vmatmul.mubr.msk.f32.gmra.mrb[12].mxu1 %vm83_vm0, %v69_v51 }
  0x36   :  { %1592 = vmatprep.mubr.msk.f32.mxu0 %vm83_vm0, %v54_v50  ;;  %1616 = vmatprep.mubr.msk.f32.mxu1 %vm83_vm0, %v70_v52 }
  0x37   :  { %1814 = vmatpush3.bf16.msra.mxu1 %v1811_v58  ;;  %1836 = vmatprep.subr.bf16.mxu0 %v1835_v27  ;;  %v763_v58 = vld [vmem:[#allocation2 + $0x70] sm:$0xff]  ;;  %v781_v27 = vld [vmem:[#allocation2 + $0x100] sm:$0xff] }
  0x38   :  { %1816 = vmatprep.subr.bf16.mxu1 %v1815_v61  ;;  %1838 = vmatpush1.bf16.msra.mxu0 %v1837_v32  ;;  %v1859_v3 = vpack.c.bf16 %v766_v59, %v763_v58  ;;  %v1871_v36 = vpack.c.bf16 %v784_v28, %v781_v27 }
  0x39   :  { %1593 = vmatmul.mubr.msk.f32.gmra.mrb[14].mxu0 %vm83_vm0, %v55_v56  ;;  %1617 = vmatmul.mubr.msk.f32.gmra.mrb[14].mxu1 %vm83_vm0, %v71_v57  ;;  %v1855_v56 = vpack.c.bf16 %v760_v48, %v757_v47 }
  0x3a   :  { %1840 = vmatprep.subr.bf16.mxu0 %v1839_v33 }
  0x3b   :  { %1818 = vmatpush3.bf16.msra.mxu1 %v1815_v61 }
  0x3c   :  { %1852 = vmatprep.subr.bf16.mxu1 %v2159_v6  ;;  %1842 = vmatpush1.bf16.msra.mxu0 %v1841_v38 }
  0x3d   :  { %1844 = vmatprep.subr.bf16.mxu0 %v1843_v39 }
  0xf0   :  { %v1573_v41 = vpop.f32.mrb[0].mxu0  ;;  %v2167_v42 = vpop.f32.mrb[0].mxu1 }
  0xf1   :  { %v2170_v43 = vadd.f32 %v1573_v41, %v2165_v40  ;;  %v246_v44 = vpop.f32.mrb[1].mxu0  ;;  %v2172_v45 = vpop.f32.mrb[1].mxu1 }
  0xf2   :  { %v2175_v46 = vadd.f32 %v2165_v40, %v246_v44 }
  0xf3   :  { %v406_v52 = vmax.f32 %v2170_v43, 0.0 }
  0xf4   :  { %v405_v49 = vmax.f32 %v2175_v46, 0.0  ;;  %v1576_v50 = vpop.f32.mrb[2].mxu0  ;;  %v2178_v51 = vpop.f32.mrb[2].mxu1 }
  0xf5   :  { %v2182_v53 = vadd.f32 %v1576_v50, %v2165_v40  ;;  %v256_v54 = vpop.f32.mrb[3].mxu0  ;;  %v2184_v55 = vpop.f32.mrb[3].mxu1 }
  0xf6   :  { %v2187_v57 = vadd.f32 %v2165_v40, %v256_v54  ;;  %1651 = vmatprep.mubr.f32.mxu1 %v405_v49  ;;  %v2293_v17 = vadd.f32 %v2165_v40, %v2184_v55 }
  0xf7   :  { %v408_v60 = vmax.f32 %v2182_v53, 0.0  ;;  %1652 = vmatmul.mubr.f32.vlgmr.msra.gmra.mrb[16].mxu1 %v406_v52 }
  0xf8   :  { %v407_v61 = vmax.f32 %v2187_v57, 0.0  ;;  %v1579_v62 = vpop.f32.mrb[4].mxu0  ;;  %v2195_v63 = vpop.f32.mrb[4].mxu1  ;;  %1854 = vmatpush3.bf16.msra.mxu1 %v2159_v6 }
  0xf9   :  { %v2199_v0 = vadd.f32 %v1579_v62, %v2165_v40  ;;  %v266_v1 = vpop.f32.mrb[5].mxu0  ;;  %v2201_v2 = vpop.f32.mrb[5].mxu1  ;;  %1856 = vmatprep.subr.bf16.mxu1 %v1855_v56  ;;  %v2272_v62 = vadd.f32 %v2165_v40, %v2172_v45  ;;  %v2287_v45 = vadd.f32 %v2167_v42, %v2165_v40  ;;  %v2302_v42 = vadd.f32 %v2178_v51, %v2165_v40 }
  0xfa   :  { %v2204_v4 = vadd.f32 %v2165_v40, %v266_v1  ;;  %1654 = vmatprep.mubr.f32.mxu1 %v407_v61  ;;  %v2309_v55 = vadd.f32 %v2165_v40, %v2201_v2  ;;  %v2316_v27 = vadd.f32 %v2195_v63, %v2165_v40 }
  0xfb   :  { %v410_v8 = vmax.f32 %v2199_v0, 0.0  ;;  %1655 = vmatmul.mubr.f32.gmra.mrb[18].mxu1 %v408_v60  ;;  %v2993_v16 = vmax.f32 %v2272_v62, 0.0 }
  0xfc   :  { %v409_v6 = vmax.f32 %v2204_v4, 0.0  ;;  %v1582_v9 = vpop.f32.mrb[6].mxu0  ;;  %v2212_v10 = vpop.f32.mrb[6].mxu1  ;;  %1858 = vmatpush3.bf16.msra.mxu1 %v1855_v56  ;;  %v2987_v51 = vmax.f32 %v2309_v55, 0.0  ;;  %v2985_v2 = vmax.f32 %v2316_v27, 0.0 }
  0xfd   :  { %v2215_v11 = vadd.f32 %v1582_v9, %v2165_v40  ;;  %v276_v12 = vpop.f32.mrb[7].mxu0  ;;  %v2217_v13 = vpop.f32.mrb[7].mxu1  ;;  %1860 = vmatprep.subr.bf16.mxu1 %v1859_v3 }
  0xfe   :  { %v2220_v15 = vadd.f32 %v2165_v40, %v276_v12  ;;  %1657 = vmatprep.mubr.f32.mxu1 %v409_v6  ;;  %v2323_v28 = vadd.f32 %v2165_v40, %v2217_v13 }
  0xff   :  { %v412_v18 = vmax.f32 %v2215_v11, 0.0  ;;  %1658 = vmatmul.mubr.f32.gmra.mrb[20].mxu1 %v410_v8 }
 0x100   :  { %v411_v19 = vmax.f32 %v2220_v15, 0.0  ;;  %v1585_v20 = vpop.f32.mrb[8].mxu0  ;;  %v2228_v21 = vpop.f32.mrb[8].mxu1  ;;  %1862 = vmatpush3.bf16.msra.mxu1 %v1859_v3  ;;  %v2984_v63 = vmax.f32 %v2323_v28, 0.0 }
 0x101   :  { %v2231_v22 = vadd.f32 %v1585_v20, %v2165_v40  ;;  %v286_v23 = vpop.f32.mrb[9].mxu0  ;;  %v2233_v24 = vpop.f32.mrb[9].mxu1  ;;  %1864 = vmatprep.subr.bf16.mxu1 %v1863_v14  ;;  %v2991_v20 = vmax.f32 %v2287_v45, 0.0 }
 0x102   :  { %v2236_v26 = vadd.f32 %v2165_v40, %v286_v23  ;;  %1660 = vmatprep.mubr.f32.mxu1 %v411_v19  ;;  %v2989_v23 = vmax.f32 %v2293_v17, 0.0 }
 0x103   :  { %v414_v29 = vmax.f32 %v2231_v22, 0.0  ;;  %1661 = vmatmul.mubr.f32.gmra.mrb[22].mxu1 %v412_v18 }
 0x104   :  { %v413_v30 = vmax.f32 %v2236_v26, 0.0  ;;  %v1588_v31 = vpop.f32.mrb[10].mxu0  ;;  %v2244_v32 = vpop.f32.mrb[10].mxu1  ;;  %1866 = vmatpush3.bf16.msra.mxu1 %v1863_v14 }
 0x105   :  { %v2247_v33 = vadd.f32 %v1588_v31, %v2165_v40  ;;  %v296_v34 = vpop.f32.mrb[11].mxu0  ;;  %v376_v35 = vpop.f32.mrb[11].mxu1  ;;  %1868 = vmatprep.subr.bf16.mxu1 %v1867_v25  ;;  %v2330_v31 = vadd.f32 %v2212_v10, %v2165_v40 }
 0x106   :  { %v2250_v37 = vadd.f32 %v2165_v40, %v296_v34  ;;  %1663 = vmatprep.mubr.f32.mxu1 %v413_v30  ;;  %v2337_v34 = vadd.f32 %v2165_v40, %v2233_v24 }
 0x107   :  { %v416_v38 = vmax.f32 %v2247_v33, 0.0  ;;  %1664 = vmatmul.mubr.f32.gmra.mrb[24].mxu1 %v414_v29  ;;  %v2979_v13 = vmax.f32 %v2330_v31, 0.0 }
 0x108   :  { %v415_v39 = vmax.f32 %v2250_v37, 0.0  ;;  %v1591_v41 = vpop.f32.mrb[12].mxu0  ;;  %v1615_v44 = vpop.f32.mrb[12].mxu1  ;;  %1870 = vmatpush3.bf16.msra.mxu1 %v1867_v25  ;;  %v2988_v25 = vmax.f32 %v2302_v42, 0.0  ;;  %v2980_v10 = vmax.f32 %v2337_v34, 0.0 }
 0x109   :  { %v2259_v47 = vadd.f32 %v1591_v41, %v2165_v40  ;;  %v306_v48 = vpop.f32.mrb[13].mxu0  ;;  %v386_v50 = vpop.f32.mrb[13].mxu1  ;;  %1872 = vmatprep.subr.bf16.mxu1 %v1871_v36  ;;  %v2350_v41 = vadd.f32 %v2165_v40, %v376_v35 }
 0x10a   :  { %v2262_v54 = vadd.f32 %v2165_v40, %v306_v48  ;;  %1666 = vmatprep.mubr.f32.mxu1 %v415_v39  ;;  %v2357_v48 = vadd.f32 %v2244_v32, %v2165_v40 }
 0x10b   :  { %v418_v56 = vmax.f32 %v2259_v47, 0.0  ;;  %1667 = vmatmul.mubr.f32.gmra.mrb[26].mxu1 %v416_v38 }
 0x10c   :  { %v417_v58 = vmax.f32 %v2262_v54, 0.0  ;;  %v1594_v59 = vpop.f32.mrb[14].mxu0  ;;  %v1618_v1 = vpop.f32.mrb[14].mxu1  ;;  %1874 = vmatpush3.bf16.msra.mxu1 %v1871_v36  ;;  %v2344_v36 = vadd.f32 %v2228_v21, %v2165_v40  ;;  %v2983_v21 = vmax.f32 %v2350_v41, 0.0  ;;  %v2982_v35 = vmax.f32 %v2357_v48, 0.0 }
 0x10d   :  { %v2275_v3 = vadd.f32 %v1594_v59, %v2165_v40  ;;  %v316_v5 = vpop.f32.mrb[15].mxu0  ;;  %v396_v7 = vpop.f32.mrb[15].mxu1  ;;  %v2363_v59 = vadd.f32 %v2165_v40, %v386_v50  ;;  %v2381_v50 = vadd.f32 %v1618_v1, %v2165_v40 }
 0x10e   :  { %v2278_v9 = vadd.f32 %v2165_v40, %v316_v5  ;;  %1669 = vmatprep.mubr.f32.mxu1 %v417_v58  ;;  %v2981_v24 = vmax.f32 %v2344_v36, 0.0  ;;  %v2369_v5 = vadd.f32 %v1615_v44, %v2165_v40  ;;  %v2375_v32 = vadd.f32 %v2165_v40, %v396_v7  ;;  %v785_v7 = vld [vmem:[#allocation2 + $0x120] sm:$0xff]  ;;  %v787_v40 = vld [vmem:[#allocation2 + $0x130] sm:$0xff] }
 0x10f   :  { %v420_v12 = vmax.f32 %v2275_v3, 0.0  ;;  %1670 = vmatmul.mubr.f32.gmra.mrb[28].mxu1 %v418_v56  ;;  %v2994_v44 = vmax.f32 %v2381_v50, 0.0 }
 0x110   :  { %v419_v14 = vmax.f32 %v2278_v9, 0.0  ;;  %v2995_v9 = vmax.f32 %v2272_v62, 0.0  ;;  %v2997_v62 = vmax.f32 %v2293_v17, 0.0  ;;  %v2999_v17 = vmax.f32 %v2309_v55, 0.0 }
 0x111   :  { %v3001_v55 = vmax.f32 %v2323_v28, 0.0  ;;  %v3003_v28 = vmax.f32 %v2337_v34, 0.0  ;;  %v3005_v34 = vmax.f32 %v2350_v41, 0.0  ;;  %v3007_v41 = vmax.f32 %v2363_v59, 0.0 }
 0x112   :  { %1672 = vmatprep.mubr.f32.mxu1 %v419_v14 }
 0x113   :  { %1673 = vmatmul.mubr.f32.gmra.mrb[30].mxu1 %v420_v12 }
 0x114   :  { %1675 = vmatprep.mubr.f32.mxu1 %v2993_v16 }
 0x117   :  { %1676 = vmatmul.mubr.f32.gmra.mrb[32].mxu1 %v2991_v20 }
 0x118   :  { %1678 = vmatprep.mubr.f32.mxu1 %v2989_v23  ;;  %v794_v23 = vld [vmem:[#allocation2 + $0x168] sm:$0xff] }
 0x11b   :  { %1679 = vmatmul.mubr.f32.gmra.mrb[34].mxu1 %v2988_v25  ;;  %v791_v25 = vld [vmem:[#allocation2 + $0x150] sm:$0xff] }
 0x11c   :  { %1681 = vmatprep.mubr.f32.mxu1 %v2987_v51  ;;  %v1849_v20 = vpack.c.bf16 %v794_v23, %v791_v25 }
 0x11f   :  { %1682 = vmatmul.mubr.f32.gmra.mrb[36].mxu1 %v2985_v2  ;;  %v792_v2 = vld [vmem:[#allocation2 + $0x158] sm:$0xff] }
 0x120   :  { %1684 = vmatprep.mubr.f32.mxu1 %v2984_v63 }
 0x123   :  { %1685 = vmatmul.mubr.f32.gmra.mrb[38].mxu1 %v2979_v13  ;;  %v2986_v13 = vmax.f32 %v2363_v59, 0.0 }
 0x124   :  { %1687 = vmatprep.mubr.f32.mxu1 %v2980_v10  ;;  %v2990_v10 = vmax.f32 %v2369_v5, 0.0 }
 0x127   :  { %1688 = vmatmul.mubr.f32.gmra.mrb[40].mxu1 %v2981_v24  ;;  %v2992_v24 = vmax.f32 %v2375_v32, 0.0 }
 0x128   :  { %1690 = vmatprep.mubr.f32.mxu1 %v2983_v21  ;;  %v790_v21 = vld [vmem:[#allocation2 + $0x148] sm:$0xff] }
 0x129   :  { %v1875_v63 = vpack.c.bf16 %v790_v21, %v787_v40  ;;  %v2397_v21 = vld [vmem:[%s2975_s4] ss:$0 sm:$0xff] }
 0x12b   :  { %1691 = vmatmul.mubr.f32.gmra.mrb[42].mxu1 %v2982_v35  ;;  %v788_v35 = vld [vmem:[#allocation2 + $0x138] sm:$0xff]  ;;  %1876 = vmatprep.subr.bf16.mxu1 %v1875_v63 }
 0x12c   :  { %1693 = vmatprep.mubr.f32.mxu1 %v2986_v13  ;;  %v1845_v1 = vpack.c.bf16 %v788_v35, %v785_v7  ;;  %v795_v13 = vld [vmem:[#allocation2 + $0x170] sm:$0xff]  ;;  %1878 = vmatpush3.bf16.msra.mxu1 %v1875_v63 }
 0x12d   :  { %v1847_v51 = vpack.c.bf16 %v795_v13, %v792_v2 }
 0x12e   :  { %1846 = vmatpush1.bf16.msra.mxu0 %v1845_v1 }
 0x12f   :  { %1694 = vmatmul.mubr.f32.gmra.mrb[44].mxu1 %v2990_v10  ;;  %v793_v10 = vld [vmem:[#allocation2 + $0x160] sm:$0xff]  ;;  %1848 = vmatprep.subr.bf16.mxu0 %v1847_v51 }
 0x130   :  { %1696 = vmatprep.mubr.f32.mxu1 %v2992_v24  ;;  %v796_v24 = vld [vmem:[#allocation2 + $0x178] sm:$0xff] }
 0x131   :  { %v1879_v16 = vpack.c.bf16 %v796_v24, %v793_v10 }
 0x132   :  { %1850 = vmatpush1.bf16.msra.mxu0 %v1849_v20 }
 0x133   :  { %1697 = vmatmul.mubr.f32.gmra.mrb[46].mxu1 %v2994_v44  ;;  %1880 = vmatprep.subr.bf16.mxu1 %v1879_v16  ;;  %v1918_v44 = vmov 0.0  }
 0x134   :  { %1882 = vmatpush3.bf16.msra.mxu1 %v1879_v16  ;;  %878 = vmatprep.mubr.f32.mxu0 %v1918_v44 }
 0x1ca   :  { %v1653_v2 = vpop.f32.mrb[16].mxu1 }
 0x1cb   :  { %v532_v13 = vadd.f32 %v1653_v2, %v2397_v21  ;;  %v526_v35 = vpop.f32.mrb[17].mxu1 }
 0x1cc   :  { %v527_v23 = vadd.f32 %v2397_v21, %v526_v35 }
 0x1cd   :  { %v686_v25 = vmax.f32 %v532_v13, 0.0 }
 0x1ce   :  { %v685_v51 = vmax.f32 %v527_v23, 0.0  ;;  %v1656_v63 = vpop.f32.mrb[18].mxu1 }
 0x1cf   :  { %v542_v20 = vadd.f32 %v1656_v63, %v2397_v21  ;;  %v536_v16 = vpop.f32.mrb[19].mxu1  ;;  %v718_v7 = vadd.f32 %v686_v25, %v406_v52 }
 0x1d0   :  { %v717_v10 = vadd.f32 %v685_v51, %v405_v49  ;;  %v537_v24 = vadd.f32 %v2397_v21, %v536_v16 }
 0x1d1   :  { %v688_v40 = vmax.f32 %v542_v20, 0.0 }
 0x1d2   :  { %v687_v1 = vmax.f32 %v537_v24, 0.0  ;;  %v1659_v2 = vpop.f32.mrb[20].mxu1  ;;  %879 = vmatmul.mubr.f32.vlgmr.msra.gmra.mrb[16].mxu0 %v717_v10  ;;  %1731 = vmatprep.mubr.f32.mxu1 %v717_v10 }
 0x1d3   :  { %v552_v13 = vadd.f32 %v1659_v2, %v2397_v21  ;;  %v546_v35 = vpop.f32.mrb[21].mxu1  ;;  %1732 = vmatmul.mubr.f32.vlgmr.msra.gmra.mrb[48].mxu1 %v718_v7  ;;  %884 = vmatprep.mubr.f32.mxu0 %v1918_v44  ;;  %v720_v43 = vadd.f32 %v688_v40, %v408_v60 }
 0x1d4   :  { %v719_v46 = vadd.f32 %v687_v1, %v407_v61  ;;  %v547_v49 = vadd.f32 %v2397_v21, %v546_v35 }
 0x1d5   :  { %v690_v52 = vmax.f32 %v552_v13, 0.0 }
 0x1d6   :  { %v689_v23 = vmax.f32 %v547_v49, 0.0  ;;  %v1662_v25 = vpop.f32.mrb[22].mxu1  ;;  %885 = vmatmul.mubr.f32.gmra.mrb[18].mxu0 %v718_v7  ;;  %1734 = vmatprep.mubr.f32.mxu1 %v719_v46 }
 0x1d7   :  { %v562_v51 = vadd.f32 %v1662_v25, %v2397_v21  ;;  %v556_v63 = vpop.f32.mrb[23].mxu1  ;;  %1735 = vmatmul.mubr.f32.gmra.mrb[50].mxu1 %v720_v43  ;;  %890 = vmatprep.mubr.f32.mxu0 %v1918_v44  ;;  %v722_v53 = vadd.f32 %v690_v52, %v410_v8 }
 0x1d8   :  { %v721_v57 = vadd.f32 %v689_v23, %v409_v6  ;;  %v557_v61 = vadd.f32 %v2397_v21, %v556_v63 }
 0x1d9   :  { %v692_v60 = vmax.f32 %v562_v51, 0.0 }
 0x1da   :  { %v691_v20 = vmax.f32 %v557_v61, 0.0  ;;  %v1665_v16 = vpop.f32.mrb[24].mxu1  ;;  %891 = vmatmul.mubr.f32.gmra.mrb[20].mxu0 %v719_v46  ;;  %1737 = vmatprep.mubr.f32.mxu1 %v721_v57 }
 0x1db   :  { %v572_v10 = vadd.f32 %v1665_v16, %v2397_v21  ;;  %v566_v24 = vpop.f32.mrb[25].mxu1  ;;  %1738 = vmatmul.mubr.f32.gmra.mrb[52].mxu1 %v722_v53  ;;  %896 = vmatprep.mubr.f32.mxu0 %v1918_v44  ;;  %v724_v0 = vadd.f32 %v692_v60, %v412_v18 }
 0x1dc   :  { %v723_v4 = vadd.f32 %v691_v20, %v411_v19  ;;  %v567_v6 = vadd.f32 %v2397_v21, %v566_v24 }
 0x1dd   :  { %v694_v8 = vmax.f32 %v572_v10, 0.0 }
 0x1de   :  { %v693_v7 = vmax.f32 %v567_v6, 0.0  ;;  %v1668_v40 = vpop.f32.mrb[26].mxu1  ;;  %897 = vmatmul.mubr.f32.gmra.mrb[22].mxu0 %v720_v43  ;;  %1740 = vmatprep.mubr.f32.mxu1 %v723_v4 }
 0x1df   :  { %v582_v1 = vadd.f32 %v1668_v40, %v2397_v21  ;;  %v576_v2 = vpop.f32.mrb[27].mxu1  ;;  %1741 = vmatmul.mubr.f32.gmra.mrb[54].mxu1 %v724_v0  ;;  %902 = vmatprep.mubr.f32.mxu0 %v1918_v44  ;;  %v2435_v11 = vadd.f32 %v694_v8, %v414_v29  ;;  %v2998_v40 = vmax.f32 %v2302_v42, 0.0 }
 0x1e0   :  { %v725_v15 = vadd.f32 %v693_v7, %v413_v30  ;;  %v577_v19 = vadd.f32 %v2397_v21, %v576_v2 }
 0x1e1   :  { %v696_v18 = vmax.f32 %v582_v1, 0.0 }
 0x1e2   :  { %v695_v13 = vmax.f32 %v577_v19, 0.0  ;;  %v1671_v35 = vpop.f32.mrb[28].mxu1  ;;  %903 = vmatmul.mubr.f32.gmra.mrb[24].mxu0 %v721_v57  ;;  %1743 = vmatprep.mubr.f32.mxu1 %v725_v15 }
 0x1e3   :  { %v592_v46 = vadd.f32 %v1671_v35, %v2397_v21  ;;  %v586_v49 = vpop.f32.mrb[29].mxu1  ;;  %1744 = vmatmul.mubr.f32.gmra.mrb[56].mxu1 %v2435_v11  ;;  %908 = vmatprep.mubr.f32.mxu0 %v1918_v44  ;;  %v2447_v29 = vadd.f32 %v696_v18, %v416_v38 }
 0x1e4   :  { %v2442_v26 = vadd.f32 %v695_v13, %v415_v39  ;;  %v587_v22 = vadd.f32 %v2397_v21, %v586_v49 }
 0x1e5   :  { %v698_v30 = vmax.f32 %v592_v46, 0.0  ;;  %v3000_v46 = vmax.f32 %v2316_v27, 0.0 }
 0x1e6   :  { %v697_v43 = vmax.f32 %v587_v22, 0.0  ;;  %v1674_v52 = vpop.f32.mrb[30].mxu1  ;;  %909 = vmatmul.mubr.f32.gmra.mrb[26].mxu0 %v722_v53  ;;  %1746 = vmatprep.mubr.f32.mxu1 %v2442_v26 }
 0x1e7   :  { %v602_v23 = vadd.f32 %v1674_v52, %v2397_v21  ;;  %v596_v25 = vpop.f32.mrb[31].mxu1  ;;  %1747 = vmatmul.mubr.f32.gmra.mrb[58].mxu1 %v2447_v29  ;;  %914 = vmatprep.mubr.f32.mxu0 %v1918_v44  ;;  %v2460_v38 = vadd.f32 %v698_v30, %v418_v56 }
 0x1e8   :  { %v2455_v37 = vadd.f32 %v697_v43, %v417_v58  ;;  %v597_v33 = vadd.f32 %v2397_v21, %v596_v25  ;;  %v3002_v25 = vmax.f32 %v2330_v31, 0.0  ;;  %v3004_v31 = vmax.f32 %v2344_v36, 0.0 }
 0x1e9   :  { %v700_v39 = vmax.f32 %v602_v23, 0.0  ;;  %v3006_v36 = vmax.f32 %v2357_v48, 0.0  ;;  %v3008_v48 = vmax.f32 %v2369_v5, 0.0  ;;  %v799_v5 = vlaneseq }
 0x1ea   :  { %v699_v51 = vmax.f32 %v597_v33, 0.0  ;;  %v1677_v63 = vpop.f32.mrb[32].mxu1  ;;  %915 = vmatmul.mubr.f32.gmra.mrb[28].mxu0 %v723_v4  ;;  %1749 = vmatprep.mubr.f32.mxu1 %v2455_v37 }
 0x1eb   :  { %v612_v57 = vadd.f32 %v1677_v63, %v2397_v21  ;;  %v606_v61 = vpop.f32.mrb[33].mxu1  ;;  %1750 = vmatmul.mubr.f32.gmra.mrb[60].mxu1 %v2460_v38  ;;  %920 = vmatprep.mubr.f32.mxu0 %v1918_v44  ;;  %v2473_v56 = vadd.f32 %v700_v39, %v420_v12  ;;  %v2996_v12 = vmax.f32 %v2287_v45, 0.0 }
 0x1ec   :  { %v2468_v54 = vadd.f32 %v699_v51, %v419_v14  ;;  %v607_v47 = vadd.f32 %v2397_v21, %v606_v61 }
 0x1ed   :  { %v702_v58 = vmax.f32 %v612_v57, 0.0 }
 0x1ee   :  { %v701_v53 = vmax.f32 %v607_v47, 0.0  ;;  %v1680_v60 = vpop.f32.mrb[34].mxu1  ;;  %921 = vmatmul.mubr.f32.gmra.mrb[30].mxu0 %v724_v0  ;;  %1752 = vmatprep.mubr.f32.mxu1 %v2468_v54 }
 0x1ef   :  { %v622_v20 = vadd.f32 %v1680_v60, %v2397_v21  ;;  %v616_v16 = vpop.f32.mrb[35].mxu1  ;;  %1753 = vmatmul.mubr.f32.gmra.mrb[62].mxu1 %v2473_v56  ;;  %926 = vmatprep.mubr.f32.mxu0 %v1918_v44  ;;  %v2486_v10 = vadd.f32 %v702_v58, %v2996_v12 }
 0x1f0   :  { %v2481_v14 = vadd.f32 %v701_v53, %v2995_v9  ;;  %v617_v3 = vadd.f32 %v2397_v21, %v616_v16 }
 0x1f1   :  { %v704_v24 = vmax.f32 %v622_v20, 0.0 }
 0x1f2   :  { %v703_v4 = vmax.f32 %v617_v3, 0.0  ;;  %v1683_v6 = vpop.f32.mrb[36].mxu1  ;;  %927 = vmatmul.mubr.f32.gmra.mrb[32].mxu0 %v725_v15  ;;  %1755 = vmatprep.mubr.f32.mxu1 %v2481_v14 }
 0x1f3   :  { %v632_v0 = vadd.f32 %v1683_v6, %v2397_v21  ;;  %v626_v8 = vpop.f32.mrb[37].mxu1  ;;  %1756 = vmatmul.mubr.f32.gmra.mrb[64].mxu1 %v2486_v10  ;;  %932 = vmatprep.mubr.f32.mxu0 %v1918_v44  ;;  %v2499_v1 = vadd.f32 %v704_v24, %v2998_v40 }
 0x1f4   :  { %v2494_v7 = vadd.f32 %v703_v4, %v2997_v62  ;;  %v627_v45 = vadd.f32 %v2397_v21, %v626_v8 }
 0x1f5   :  { %v706_v2 = vmax.f32 %v632_v0, 0.0 }
 0x1f6   :  { %v705_v15 = vmax.f32 %v627_v45, 0.0  ;;  %v1686_v19 = vpop.f32.mrb[38].mxu1  ;;  %933 = vmatmul.mubr.f32.gmra.mrb[34].mxu0 %v2435_v11  ;;  %1758 = vmatprep.mubr.f32.mxu1 %v2494_v7 }
 0x1f7   :  { %v642_v18 = vadd.f32 %v1686_v19, %v2397_v21  ;;  %v636_v13 = vpop.f32.mrb[39].mxu1  ;;  %1759 = vmatmul.mubr.f32.gmra.mrb[66].mxu1 %v2499_v1  ;;  %938 = vmatprep.mubr.f32.mxu0 %v1918_v44  ;;  %v2513_v49 = vadd.f32 %v706_v2, %v3000_v46  ;;  %v3010_v19 = vmax.f32 %v2381_v50, 0.0 }
 0x1f8   :  { %v2508_v35 = vadd.f32 %v705_v15, %v2999_v17  ;;  %v637_v42 = vadd.f32 %v2397_v21, %v636_v13 }
 0x1f9   :  { %v708_v11 = vmax.f32 %v642_v18, 0.0 }
 0x1fa   :  { %v707_v22 = vmax.f32 %v637_v42, 0.0  ;;  %v1689_v30 = vpop.f32.mrb[40].mxu1  ;;  %939 = vmatmul.mubr.f32.gmra.mrb[36].mxu0 %v2442_v26  ;;  %1761 = vmatprep.mubr.f32.mxu1 %v2508_v35 }
 0x1fb   :  { %v652_v43 = vadd.f32 %v1689_v30, %v2397_v21  ;;  %v646_v52 = vpop.f32.mrb[41].mxu1  ;;  %1762 = vmatmul.mubr.f32.gmra.mrb[68].mxu1 %v2513_v49  ;;  %944 = vmatprep.mubr.f32.mxu0 %v1918_v44  ;;  %v740_v33 = vadd.f32 %v708_v11, %v3002_v25 }
 0x1fc   :  { %v739_v23 = vadd.f32 %v707_v22, %v3001_v55  ;;  %v647_v27 = vadd.f32 %v2397_v21, %v646_v52 }
 0x1fd   :  { %v710_v39 = vmax.f32 %v652_v43, 0.0 }
 0x1fe   :  { %v709_v51 = vmax.f32 %v647_v27, 0.0  ;;  %v1692_v26 = vpop.f32.mrb[42].mxu1  ;;  %945 = vmatmul.mubr.f32.gmra.mrb[38].mxu0 %v2447_v29  ;;  %1764 = vmatprep.mubr.f32.mxu1 %v739_v23 }
 0x1ff   :  { %v662_v63 = vadd.f32 %v1692_v26, %v2397_v21  ;;  %v656_v57 = vpop.f32.mrb[43].mxu1  ;;  %1765 = vmatmul.mubr.f32.gmra.mrb[70].mxu1 %v740_v33  ;;  %950 = vmatprep.mubr.f32.mxu0 %v1918_v44  ;;  %v742_v58 = vadd.f32 %v710_v39, %v3004_v31 }
 0x200   :  { %v741_v61 = vadd.f32 %v709_v51, %v3003_v28  ;;  %v657_v47 = vadd.f32 %v2397_v21, %v656_v57 }
 0x201   :  { %v712_v53 = vmax.f32 %v662_v63, 0.0 }
 0x202   :  { %v711_v60 = vmax.f32 %v657_v47, 0.0  ;;  %v1695_v20 = vpop.f32.mrb[44].mxu1  ;;  %951 = vmatmul.mubr.f32.gmra.mrb[40].mxu0 %v2455_v37  ;;  %1767 = vmatprep.mubr.f32.mxu1 %v741_v61 }
 0x203   :  { %v672_v29 = vadd.f32 %v1695_v20, %v2397_v21  ;;  %v666_v16 = vpop.f32.mrb[45].mxu1  ;;  %1768 = vmatmul.mubr.f32.gmra.mrb[72].mxu1 %v742_v58  ;;  %956 = vmatprep.mubr.f32.mxu0 %v1918_v44  ;;  %v744_v12 = vadd.f32 %v712_v53, %v3006_v36 }
 0x204   :  { %v743_v9 = vadd.f32 %v711_v60, %v3005_v34  ;;  %v667_v3 = vadd.f32 %v2397_v21, %v666_v16 }
 0x205   :  { %v714_v24 = vmax.f32 %v672_v29, 0.0 }
 0x206   :  { %v713_v4 = vmax.f32 %v667_v3, 0.0  ;;  %v1698_v6 = vpop.f32.mrb[46].mxu1  ;;  %957 = vmatmul.mubr.f32.gmra.mrb[42].mxu0 %v2460_v38  ;;  %1770 = vmatprep.mubr.f32.mxu1 %v743_v9  ;;  %v3009_v38 = vmax.f32 %v2375_v32, 0.0  ;;  %v800_v32 = vshrl.u32 %v799_v5, 7 }
 0x207   :  { %v682_v37 = vadd.f32 %v1698_v6, %v2397_v21  ;;  %v676_v0 = vpop.f32.mrb[47].mxu1  ;;  %1771 = vmatmul.mubr.f32.gmra.mrb[74].mxu1 %v744_v12  ;;  %962 = vmatprep.mubr.f32.mxu0 %v1918_v44  ;;  %v746_v45 = vadd.f32 %v714_v24, %v3008_v48 }
 0x208   :  { %v745_v8 = vadd.f32 %v713_v4, %v3007_v41  ;;  %v677_v62 = vadd.f32 %v2397_v21, %v676_v0  ;;  %v801_v50 = vsub.s32 0, %v800_v32  ;;  %v797_v21 = vld [vmem:[%s2977_s6] sm:$0x7] }
 0x209   :  { %v716_v40 = vmax.f32 %v682_v37, 0.0 }
 0x20a   :  { %v715_v2 = vmax.f32 %v677_v62, 0.0  ;;  %963 = vmatmul.mubr.f32.gmra.mrb[44].mxu0 %v2468_v54  ;;  %1773 = vmatprep.mubr.f32.mxu1 %v745_v8  ;;  %v805_v54 = vsub.s32 1, %v800_v32 }
 0x20b   :  { %1774 = vmatmul.mubr.f32.gmra.mrb[76].mxu1 %v746_v45  ;;  %968 = vmatprep.mubr.f32.mxu0 %v1918_v44  ;;  %v748_v59 = vadd.f32 %v716_v40, %v3010_v19 }
 0x20c   :  { %v747_v15 = vadd.f32 %v715_v2, %v3009_v38 }
 0x20e   :  { %969 = vmatmul.mubr.f32.gmra.mrb[46].mxu0 %v2473_v56  ;;  %1776 = vmatprep.mubr.f32.mxu1 %v747_v15  ;;  %v809_v56 = vsub.s32 2, %v800_v32 }
 0x20f   :  { %1777 = vmatmul.mubr.f32.gmra.mrb[78].mxu1 %v748_v59  ;;  %974 = vmatprep.mubr.f32.mxu0 %v1918_v44 }
 0x212   :  { %975 = vmatmul.mubr.f32.gmra.mrb[48].mxu0 %v2481_v14  ;;  %v2581_v14 = vrot.slane %v797_v21, %v801_v50 }
 0x213   :  { %980 = vmatprep.mubr.f32.mxu0 %v1918_v44 }
 0x216   :  { %981 = vmatmul.mubr.f32.gmra.mrb[50].mxu0 %v2486_v10  ;;  %v2583_v10 = vrot.slane %v797_v21, %v805_v54 }
 0x217   :  { %986 = vmatprep.mubr.f32.mxu0 %v1918_v44 }
 0x21a   :  { %987 = vmatmul.mubr.f32.gmra.mrb[52].mxu0 %v2494_v7  ;;  %v2585_v7 = vrot.slane %v797_v21, %v809_v56 }
 0x21b   :  { %992 = vmatprep.mubr.f32.mxu0 %v1918_v44 }
 0x21e   :  { %993 = vmatmul.mubr.f32.gmra.mrb[54].mxu0 %v2499_v1 }
 0x21f   :  { %998 = vmatprep.mubr.f32.mxu0 %v1918_v44 }
 0x222   :  { %999 = vmatmul.mubr.f32.gmra.mrb[56].mxu0 %v2508_v35 }
 0x223   :  { %1004 = vmatprep.mubr.f32.mxu0 %v1918_v44 }
 0x226   :  { %1005 = vmatmul.mubr.f32.gmra.mrb[58].mxu0 %v2513_v49 }
 0x227   :  { %1010 = vmatprep.mubr.f32.mxu0 %v1918_v44 }
 0x22a   :  { %1011 = vmatmul.mubr.f32.gmra.mrb[60].mxu0 %v739_v23 }
 0x22b   :  { %1016 = vmatprep.mubr.f32.mxu0 %v1918_v44 }
 0x22e   :  { %1017 = vmatmul.mubr.f32.gmra.mrb[62].mxu0 %v740_v33 }
 0x22f   :  { %1022 = vmatprep.mubr.f32.mxu0 %v1918_v44 }
 0x232   :  { %1023 = vmatmul.mubr.f32.gmra.mrb[64].mxu0 %v741_v61 }
 0x233   :  { %1028 = vmatprep.mubr.f32.mxu0 %v1918_v44 }
 0x236   :  { %1029 = vmatmul.mubr.f32.gmra.mrb[66].mxu0 %v742_v58 }
 0x237   :  { %1034 = vmatprep.mubr.f32.mxu0 %v1918_v44 }
 0x23a   :  { %1035 = vmatmul.mubr.f32.gmra.mrb[68].mxu0 %v743_v9 }
 0x23b   :  { %1040 = vmatprep.mubr.f32.mxu0 %v1918_v44 }
 0x23e   :  { %1041 = vmatmul.mubr.f32.gmra.mrb[70].mxu0 %v744_v12 }
 0x23f   :  { %1046 = vmatprep.mubr.f32.mxu0 %v1918_v44 }
 0x242   :  { %1047 = vmatmul.mubr.f32.gmra.mrb[72].mxu0 %v745_v8 }
 0x243   :  { %1052 = vmatprep.mubr.f32.mxu0 %v1918_v44 }
 0x246   :  { %1053 = vmatmul.mubr.f32.gmra.mrb[74].mxu0 %v746_v45 }
 0x247   :  { %1058 = vmatprep.mubr.f32.mxu0 %v1918_v44 }
 0x24a   :  { %1059 = vmatmul.mubr.f32.gmra.mrb[76].mxu0 %v747_v15 }
 0x24b   :  { %1064 = vmatprep.mubr.f32.mxu0 %v1918_v44 }
 0x24e   :  { %1065 = vmatmul.mubr.f32.gmra.mrb[78].mxu0 %v748_v59 }
 0x2a5   :  { %v880_v1 = vpop.f32.mrb[16].mxu0 }
 0x2a6   :  { %v881_v18 = vadd.f32 %v880_v1, %v2581_v14  ;;  %v882_v44 = vpop.f32.mrb[17].mxu0  ;;  %v1733_v13 = vpop.f32.mrb[48].mxu1 }
 0x2a7   :  { %v883_v17 = vadd.f32 %v882_v44, %v2583_v10  ;;  %v1143_v35 = vadd.f32 %v1733_v13, %v2585_v7  ;;  %v1137_v42 = vpop.f32.mrb[49].mxu1 }
 0x2a8   :  { %1296 = vst [vmem:[%s2978_s7] sm:$0xff] %v881_v18  ;;  %v1138_v46 = vadd.f32 %v1137_v42, %v2585_v7 }
 0x2a9   :  { %1297 = vst [vmem:[%s2978_s7 + $0x8] sm:$0xff] %v883_v17  ;;  %1301 = vst [vmem:[%s2978_s7 + $0x28] sm:$0xff] %v1143_v35  ;;  %v886_v49 = vpop.f32.mrb[18].mxu0 }
 0x2aa   :  { %1298 = vst [vmem:[%s2978_s7 + $0x10] sm:$0xff] %v1138_v46  ;;  %v887_v11 = vadd.f32 %v886_v49, %v2581_v14  ;;  %v888_v22 = vpop.f32.mrb[19].mxu0  ;;  %v1736_v30 = vpop.f32.mrb[50].mxu1 }
 0x2ab   :  { %v889_v43 = vadd.f32 %v888_v22, %v2583_v10  ;;  %v1153_v52 = vadd.f32 %v1736_v30, %v2585_v7  ;;  %v1147_v55 = vpop.f32.mrb[51].mxu1 }
 0x2ac   :  { %1299 = vst [vmem:[%s2978_s7 + $0x18] sm:$0xff] %v887_v11  ;;  %v1148_v23 = vadd.f32 %v1147_v55, %v2585_v7 }
 0x2ad   :  { %1300 = vst [vmem:[%s2978_s7 + $0x20] sm:$0xff] %v889_v43  ;;  %1307 = vst [vmem:[%s2978_s7 + $0x58] sm:$0xff] %v1153_v52  ;;  %v892_v27 = vpop.f32.mrb[20].mxu0 }
 0x2ae   :  { %1304 = vst [vmem:[%s2978_s7 + $0x40] sm:$0xff] %v1148_v23  ;;  %v893_v25 = vadd.f32 %v892_v27, %v2581_v14  ;;  %v894_v33 = vpop.f32.mrb[21].mxu0  ;;  %v1739_v39 = vpop.f32.mrb[52].mxu1 }
 0x2af   :  { %v895_v51 = vadd.f32 %v894_v33, %v2583_v10  ;;  %v1163_v26 = vadd.f32 %v1739_v39, %v2585_v7  ;;  %v1157_v63 = vpop.f32.mrb[53].mxu1 }
 0x2b0   :  { %1302 = vst [vmem:[%s2978_s7 + $0x30] sm:$0xff] %v893_v25  ;;  %v1158_v57 = vadd.f32 %v1157_v63, %v2585_v7 }
 0x2b1   :  { %1303 = vst [vmem:[%s2978_s7 + $0x38] sm:$0xff] %v895_v51  ;;  %1313 = vst [vmem:[%s2978_s7 + $0x88] sm:$0xff] %v1163_v26  ;;  %v898_v28 = vpop.f32.mrb[22].mxu0 }
 0x2b2   :  { %1310 = vst [vmem:[%s2978_s7 + $0x70] sm:$0xff] %v1158_v57  ;;  %v899_v61 = vadd.f32 %v898_v28, %v2581_v14  ;;  %v900_v47 = vpop.f32.mrb[23].mxu0  ;;  %v1742_v31 = vpop.f32.mrb[54].mxu1 }
 0x2b3   :  { %v901_v58 = vadd.f32 %v900_v47, %v2583_v10  ;;  %v1173_v53 = vadd.f32 %v1742_v31, %v2585_v7  ;;  %v1167_v60 = vpop.f32.mrb[55].mxu1 }
 0x2b4   :  { %1305 = vst [vmem:[%s2978_s7 + $0x48] sm:$0xff] %v899_v61  ;;  %v1168_v20 = vadd.f32 %v1167_v60, %v2585_v7 }
 0x2b5   :  { %1306 = vst [vmem:[%s2978_s7 + $0x50] sm:$0xff] %v901_v58  ;;  %1319 = vst [vmem:[%s2978_s7 + $0xb8] sm:$0xff] %v1173_v53  ;;  %v904_v29 = vpop.f32.mrb[24].mxu0 }
 0x2b6   :  { %1316 = vst [vmem:[%s2978_s7 + $0xa0] sm:$0xff] %v1168_v20  ;;  %v905_v16 = vadd.f32 %v904_v29, %v2581_v14  ;;  %v906_v34 = vpop.f32.mrb[25].mxu0  ;;  %v1745_v9 = vpop.f32.mrb[56].mxu1 }
 0x2b7   :  { %v907_v3 = vadd.f32 %v906_v34, %v2583_v10  ;;  %v1183_v36 = vadd.f32 %v1745_v9, %v2585_v7  ;;  %v1177_v12 = vpop.f32.mrb[57].mxu1 }
 0x2b8   :  { %1308 = vst [vmem:[%s2978_s7 + $0x60] sm:$0xff] %v905_v16  ;;  %v1178_v24 = vadd.f32 %v1177_v12, %v2585_v7 }
 0x2b9   :  { %1309 = vst [vmem:[%s2978_s7 + $0x68] sm:$0xff] %v907_v3  ;;  %1325 = vst [vmem:[%s2978_s7 + $0xe8] sm:$0xff] %v1183_v36  ;;  %v910_v4 = vpop.f32.mrb[26].mxu0 }
 0x2ba   :  { %1322 = vst [vmem:[%s2978_s7 + $0xd0] sm:$0xff] %v1178_v24  ;;  %v911_v6 = vadd.f32 %v910_v4, %v2581_v14  ;;  %v912_v37 = vpop.f32.mrb[27].mxu0  ;;  %v1748_v0 = vpop.f32.mrb[58].mxu1 }
 0x2bb   :  { %v913_v41 = vadd.f32 %v912_v37, %v2583_v10  ;;  %v1193_v8 = vadd.f32 %v1748_v0, %v2585_v7  ;;  %v1187_v62 = vpop.f32.mrb[59].mxu1 }
 0x2bc   :  { %1311 = vst [vmem:[%s2978_s7 + $0x78] sm:$0xff] %v911_v6  ;;  %v1188_v48 = vadd.f32 %v1187_v62, %v2585_v7 }
 0x2bd   :  { %1312 = vst [vmem:[%s2978_s7 + $0x80] sm:$0xff] %v913_v41  ;;  %1331 = vst [vmem:[%s2978_s7 + $0x118] sm:$0xff] %v1193_v8  ;;  %v916_v45 = vpop.f32.mrb[28].mxu0 }
 0x2be   :  { %1328 = vst [vmem:[%s2978_s7 + $0x100] sm:$0xff] %v1188_v48  ;;  %v917_v40 = vadd.f32 %v916_v45, %v2581_v14  ;;  %v918_v2 = vpop.f32.mrb[29].mxu0  ;;  %v1751_v38 = vpop.f32.mrb[60].mxu1 }
 0x2bf   :  { %v919_v15 = vadd.f32 %v918_v2, %v2583_v10  ;;  %v1203_v19 = vadd.f32 %v1751_v38, %v2585_v7  ;;  %v1197_v59 = vpop.f32.mrb[61].mxu1 }
 0x2c0   :  { %1314 = vst [vmem:[%s2978_s7 + $0x90] sm:$0xff] %v917_v40  ;;  %v1198_v5 = vadd.f32 %v1197_v59, %v2585_v7 }
 0x2c1   :  { %1315 = vst [vmem:[%s2978_s7 + $0x98] sm:$0xff] %v919_v15  ;;  %1337 = vst [vmem:[%s2978_s7 + $0x148] sm:$0xff] %v1203_v19  ;;  %v922_v32 = vpop.f32.mrb[30].mxu0 }
 0x2c2   :  { %1334 = vst [vmem:[%s2978_s7 + $0x130] sm:$0xff] %v1198_v5  ;;  %v923_v50 = vadd.f32 %v922_v32, %v2581_v14  ;;  %v924_v21 = vpop.f32.mrb[31].mxu0  ;;  %v1754_v54 = vpop.f32.mrb[62].mxu1 }
 0x2c3   :  { %v925_v56 = vadd.f32 %v924_v21, %v2583_v10  ;;  %v1213_v1 = vadd.f32 %v1754_v54, %v2585_v7  ;;  %v1207_v18 = vpop.f32.mrb[63].mxu1 }
 0x2c4   :  { %1317 = vst [vmem:[%s2978_s7 + $0xa8] sm:$0xff] %v923_v50  ;;  %v1208_v44 = vadd.f32 %v1207_v18, %v2585_v7 }
 0x2c5   :  { %1318 = vst [vmem:[%s2978_s7 + $0xb0] sm:$0xff] %v925_v56  ;;  %1343 = vst [vmem:[%s2978_s7 + $0x178] sm:$0xff] %v1213_v1  ;;  %v928_v13 = vpop.f32.mrb[32].mxu0 }
 0x2c6   :  { %1340 = vst [vmem:[%s2978_s7 + $0x160] sm:$0xff] %v1208_v44  ;;  %v929_v17 = vadd.f32 %v928_v13, %v2581_v14  ;;  %v930_v35 = vpop.f32.mrb[33].mxu0  ;;  %v1757_v42 = vpop.f32.mrb[64].mxu1 }
 0x2c7   :  { %v931_v46 = vadd.f32 %v930_v35, %v2583_v10  ;;  %v1223_v49 = vadd.f32 %v1757_v42, %v2585_v7  ;;  %v1217_v11 = vpop.f32.mrb[65].mxu1 }
 0x2c8   :  { %1320 = vst [vmem:[%s2978_s7 + $0xc0] sm:$0xff] %v929_v17  ;;  %v1218_v22 = vadd.f32 %v1217_v11, %v2585_v7 }
 0x2c9   :  { %1321 = vst [vmem:[%s2978_s7 + $0xc8] sm:$0xff] %v931_v46  ;;  %1349 = vst [vmem:[%s2978_s7 + $0x1a8] sm:$0xff] %v1223_v49  ;;  %v934_v30 = vpop.f32.mrb[34].mxu0 }
 0x2ca   :  { %1346 = vst [vmem:[%s2978_s7 + $0x190] sm:$0xff] %v1218_v22  ;;  %v935_v43 = vadd.f32 %v934_v30, %v2581_v14  ;;  %v936_v52 = vpop.f32.mrb[35].mxu0  ;;  %v1760_v55 = vpop.f32.mrb[66].mxu1 }
 0x2cb   :  { %v937_v23 = vadd.f32 %v936_v52, %v2583_v10  ;;  %v1233_v27 = vadd.f32 %v1760_v55, %v2585_v7  ;;  %v1227_v25 = vpop.f32.mrb[67].mxu1 }
 0x2cc   :  { %1323 = vst [vmem:[%s2978_s7 + $0xd8] sm:$0xff] %v935_v43  ;;  %v1228_v33 = vadd.f32 %v1227_v25, %v2585_v7 }
 0x2cd   :  { %1324 = vst [vmem:[%s2978_s7 + $0xe0] sm:$0xff] %v937_v23  ;;  %1355 = vst [vmem:[%s2978_s7 + $0x1d8] sm:$0xff] %v1233_v27  ;;  %v940_v39 = vpop.f32.mrb[36].mxu0 }
 0x2ce   :  { %1352 = vst [vmem:[%s2978_s7 + $0x1c0] sm:$0xff] %v1228_v33  ;;  %v941_v51 = vadd.f32 %v940_v39, %v2581_v14  ;;  %v942_v26 = vpop.f32.mrb[37].mxu0  ;;  %v1763_v63 = vpop.f32.mrb[68].mxu1 }
 0x2cf   :  { %v943_v57 = vadd.f32 %v942_v26, %v2583_v10  ;;  %v1243_v28 = vadd.f32 %v1763_v63, %v2585_v7  ;;  %v1237_v61 = vpop.f32.mrb[69].mxu1 }
 0x2d0   :  { %1326 = vst [vmem:[%s2978_s7 + $0xf0] sm:$0xff] %v941_v51  ;;  %v1238_v47 = vadd.f32 %v1237_v61, %v2585_v7 }
 0x2d1   :  { %1327 = vst [vmem:[%s2978_s7 + $0xf8] sm:$0xff] %v943_v57  ;;  %1361 = vst [vmem:[%s2978_s7 + $0x208] sm:$0xff] %v1243_v28  ;;  %v946_v31 = vpop.f32.mrb[38].mxu0 }
 0x2d2   :  { %1358 = vst [vmem:[%s2978_s7 + $0x1f0] sm:$0xff] %v1238_v47  ;;  %v947_v58 = vadd.f32 %v946_v31, %v2581_v14  ;;  %v948_v53 = vpop.f32.mrb[39].mxu0  ;;  %v1766_v60 = vpop.f32.mrb[70].mxu1 }
 0x2d3   :  { %v949_v20 = vadd.f32 %v948_v53, %v2583_v10  ;;  %v1253_v29 = vadd.f32 %v1766_v60, %v2585_v7  ;;  %v1247_v16 = vpop.f32.mrb[71].mxu1 }
 0x2d4   :  { %1329 = vst [vmem:[%s2978_s7 + $0x108] sm:$0xff] %v947_v58  ;;  %v1248_v34 = vadd.f32 %v1247_v16, %v2585_v7 }
 0x2d5   :  { %1330 = vst [vmem:[%s2978_s7 + $0x110] sm:$0xff] %v949_v20  ;;  %1367 = vst [vmem:[%s2978_s7 + $0x238] sm:$0xff] %v1253_v29  ;;  %v952_v9 = vpop.f32.mrb[40].mxu0 }
 0x2d6   :  { %1364 = vst [vmem:[%s2978_s7 + $0x220] sm:$0xff] %v1248_v34  ;;  %v953_v3 = vadd.f32 %v952_v9, %v2581_v14  ;;  %v954_v36 = vpop.f32.mrb[41].mxu0  ;;  %v1769_v12 = vpop.f32.mrb[72].mxu1 }
 0x2d7   :  { %v955_v24 = vadd.f32 %v954_v36, %v2583_v10  ;;  %v1263_v4 = vadd.f32 %v1769_v12, %v2585_v7  ;;  %v1257_v6 = vpop.f32.mrb[73].mxu1 }
 0x2d8   :  { %1332 = vst [vmem:[%s2978_s7 + $0x120] sm:$0xff] %v953_v3  ;;  %v1258_v37 = vadd.f32 %v1257_v6, %v2585_v7 }
 0x2d9   :  { %1333 = vst [vmem:[%s2978_s7 + $0x128] sm:$0xff] %v955_v24  ;;  %1373 = vst [vmem:[%s2978_s7 + $0x268] sm:$0xff] %v1263_v4  ;;  %v958_v0 = vpop.f32.mrb[42].mxu0 }
 0x2da   :  { %1370 = vst [vmem:[%s2978_s7 + $0x250] sm:$0xff] %v1258_v37  ;;  %v959_v41 = vadd.f32 %v958_v0, %v2581_v14  ;;  %v960_v8 = vpop.f32.mrb[43].mxu0  ;;  %v1772_v62 = vpop.f32.mrb[74].mxu1 }
 0x2db   :  { %v961_v48 = vadd.f32 %v960_v8, %v2583_v10  ;;  %v1273_v45 = vadd.f32 %v1772_v62, %v2585_v7  ;;  %v1267_v40 = vpop.f32.mrb[75].mxu1 }
 0x2dc   :  { %1335 = vst [vmem:[%s2978_s7 + $0x138] sm:$0xff] %v959_v41  ;;  %v1268_v2 = vadd.f32 %v1267_v40, %v2585_v7 }
 0x2dd   :  { %1336 = vst [vmem:[%s2978_s7 + $0x140] sm:$0xff] %v961_v48  ;;  %1379 = vst [vmem:[%s2978_s7 + $0x298] sm:$0xff] %v1273_v45  ;;  %v964_v38 = vpop.f32.mrb[44].mxu0 }
 0x2de   :  { %1376 = vst [vmem:[%s2978_s7 + $0x280] sm:$0xff] %v1268_v2  ;;  %v965_v15 = vadd.f32 %v964_v38, %v2581_v14  ;;  %v966_v19 = vpop.f32.mrb[45].mxu0  ;;  %v1775_v59 = vpop.f32.mrb[76].mxu1 }
 0x2df   :  { %v967_v5 = vadd.f32 %v966_v19, %v2583_v10  ;;  %v1283_v32 = vadd.f32 %v1775_v59, %v2585_v7  ;;  %v1277_v50 = vpop.f32.mrb[77].mxu1 }
 0x2e0   :  { %1338 = vst [vmem:[%s2978_s7 + $0x150] sm:$0xff] %v965_v15  ;;  %v1278_v21 = vadd.f32 %v1277_v50, %v2585_v7 }
 0x2e1   :  { %1339 = vst [vmem:[%s2978_s7 + $0x158] sm:$0xff] %v967_v5  ;;  %1385 = vst [vmem:[%s2978_s7 + $0x2c8] sm:$0xff] %v1283_v32  ;;  %v970_v54 = vpop.f32.mrb[46].mxu0 }
 0x2e2   :  { %1382 = vst [vmem:[%s2978_s7 + $0x2b0] sm:$0xff] %v1278_v21  ;;  %v971_v56 = vadd.f32 %v970_v54, %v2581_v14  ;;  %v972_v1 = vpop.f32.mrb[47].mxu0  ;;  %v1778_v18 = vpop.f32.mrb[78].mxu1 }
 0x2e3   :  { %v973_v44 = vadd.f32 %v972_v1, %v2583_v10  ;;  %v1293_v13 = vadd.f32 %v1778_v18, %v2585_v7  ;;  %v1287_v17 = vpop.f32.mrb[79].mxu1 }
 0x2e4   :  { %1341 = vst [vmem:[%s2978_s7 + $0x168] sm:$0xff] %v971_v56  ;;  %v1288_v35 = vadd.f32 %v1287_v17, %v2585_v7 }
 0x2e5   :  { %1342 = vst [vmem:[%s2978_s7 + $0x170] sm:$0xff] %v973_v44  ;;  %1391 = vst [vmem:[%s2978_s7 + $0x2f8] sm:$0xff] %v1293_v13  ;;  %v976_v42 = vpop.f32.mrb[48].mxu0 }
 0x2e6   :  { %1388 = vst [vmem:[%s2978_s7 + $0x2e0] sm:$0xff] %v1288_v35  ;;  %v977_v46 = vadd.f32 %v976_v42, %v2581_v14  ;;  %v978_v49 = vpop.f32.mrb[49].mxu0 }
 0x2e7   :  { %v979_v11 = vadd.f32 %v978_v49, %v2583_v10 }
 0x2e8   :  { %1344 = vst [vmem:[%s2978_s7 + $0x180] sm:$0xff] %v977_v46 }
 0x2e9   :  { %1345 = vst [vmem:[%s2978_s7 + $0x188] sm:$0xff] %v979_v11  ;;  %v982_v7 = vpop.f32.mrb[50].mxu0 }
 0x2ea   :  { %v983_v22 = vadd.f32 %v982_v7, %v2581_v14  ;;  %v984_v30 = vpop.f32.mrb[51].mxu0 }
 0x2eb   :  { %v985_v43 = vadd.f32 %v984_v30, %v2583_v10 }
 0x2ec   :  { %1347 = vst [vmem:[%s2978_s7 + $0x198] sm:$0xff] %v983_v22 }
 0x2ed   :  { %1348 = vst [vmem:[%s2978_s7 + $0x1a0] sm:$0xff] %v985_v43  ;;  %v988_v52 = vpop.f32.mrb[52].mxu0 }
 0x2ee   :  { %v989_v55 = vadd.f32 %v988_v52, %v2581_v14  ;;  %v990_v23 = vpop.f32.mrb[53].mxu0 }
 0x2ef   :  { %v991_v27 = vadd.f32 %v990_v23, %v2583_v10 }
 0x2f0   :  { %1350 = vst [vmem:[%s2978_s7 + $0x1b0] sm:$0xff] %v989_v55 }
 0x2f1   :  { %1351 = vst [vmem:[%s2978_s7 + $0x1b8] sm:$0xff] %v991_v27  ;;  %v994_v25 = vpop.f32.mrb[54].mxu0 }
 0x2f2   :  { %v995_v33 = vadd.f32 %v994_v25, %v2581_v14  ;;  %v996_v39 = vpop.f32.mrb[55].mxu0 }
 0x2f3   :  { %v997_v51 = vadd.f32 %v996_v39, %v2583_v10 }
 0x2f4   :  { %1353 = vst [vmem:[%s2978_s7 + $0x1c8] sm:$0xff] %v995_v33 }
 0x2f5   :  { %1354 = vst [vmem:[%s2978_s7 + $0x1d0] sm:$0xff] %v997_v51  ;;  %v1000_v26 = vpop.f32.mrb[56].mxu0 }
 0x2f6   :  { %v1001_v63 = vadd.f32 %v1000_v26, %v2581_v14  ;;  %v1002_v57 = vpop.f32.mrb[57].mxu0 }
 0x2f7   :  { %v1003_v28 = vadd.f32 %v1002_v57, %v2583_v10 }
 0x2f8   :  { %1356 = vst [vmem:[%s2978_s7 + $0x1e0] sm:$0xff] %v1001_v63 }
 0x2f9   :  { %1357 = vst [vmem:[%s2978_s7 + $0x1e8] sm:$0xff] %v1003_v28  ;;  %v1006_v61 = vpop.f32.mrb[58].mxu0 }
 0x2fa   :  { %v1007_v47 = vadd.f32 %v1006_v61, %v2581_v14  ;;  %v1008_v31 = vpop.f32.mrb[59].mxu0 }
 0x2fb   :  { %v1009_v58 = vadd.f32 %v1008_v31, %v2583_v10 }
 0x2fc   :  { %1359 = vst [vmem:[%s2978_s7 + $0x1f8] sm:$0xff] %v1007_v47 }
 0x2fd   :  { %1360 = vst [vmem:[%s2978_s7 + $0x200] sm:$0xff] %v1009_v58  ;;  %v1012_v53 = vpop.f32.mrb[60].mxu0 }
 0x2fe   :  { %v1013_v60 = vadd.f32 %v1012_v53, %v2581_v14  ;;  %v1014_v20 = vpop.f32.mrb[61].mxu0 }
 0x2ff   :  { %v1015_v29 = vadd.f32 %v1014_v20, %v2583_v10 }
 0x300   :  { %1362 = vst [vmem:[%s2978_s7 + $0x210] sm:$0xff] %v1013_v60 }
 0x301   :  { %1363 = vst [vmem:[%s2978_s7 + $0x218] sm:$0xff] %v1015_v29  ;;  %v1018_v16 = vpop.f32.mrb[62].mxu0 }
 0x302   :  { %v1019_v34 = vadd.f32 %v1018_v16, %v2581_v14  ;;  %v1020_v9 = vpop.f32.mrb[63].mxu0 }
 0x303   :  { %v1021_v3 = vadd.f32 %v1020_v9, %v2583_v10 }
 0x304   :  { %1365 = vst [vmem:[%s2978_s7 + $0x228] sm:$0xff] %v1019_v34 }
 0x305   :  { %1366 = vst [vmem:[%s2978_s7 + $0x230] sm:$0xff] %v1021_v3  ;;  %v1024_v36 = vpop.f32.mrb[64].mxu0 }
 0x306   :  { %v1025_v12 = vadd.f32 %v1024_v36, %v2581_v14  ;;  %v1026_v24 = vpop.f32.mrb[65].mxu0 }
 0x307   :  { %v1027_v4 = vadd.f32 %v1026_v24, %v2583_v10 }
 0x308   :  { %1368 = vst [vmem:[%s2978_s7 + $0x240] sm:$0xff] %v1025_v12 }
 0x309   :  { %1369 = vst [vmem:[%s2978_s7 + $0x248] sm:$0xff] %v1027_v4  ;;  %v1030_v6 = vpop.f32.mrb[66].mxu0 }
 0x30a   :  { %v1031_v37 = vadd.f32 %v1030_v6, %v2581_v14  ;;  %v1032_v0 = vpop.f32.mrb[67].mxu0 }
 0x30b   :  { %v1033_v41 = vadd.f32 %v1032_v0, %v2583_v10 }
 0x30c   :  { %1371 = vst [vmem:[%s2978_s7 + $0x258] sm:$0xff] %v1031_v37 }
 0x30d   :  { %1372 = vst [vmem:[%s2978_s7 + $0x260] sm:$0xff] %v1033_v41  ;;  %v1036_v8 = vpop.f32.mrb[68].mxu0 }
 0x30e   :  { %v1037_v62 = vadd.f32 %v1036_v8, %v2581_v14  ;;  %v1038_v48 = vpop.f32.mrb[69].mxu0 }
 0x30f   :  { %v1039_v45 = vadd.f32 %v1038_v48, %v2583_v10 }
 0x310   :  { %1374 = vst [vmem:[%s2978_s7 + $0x270] sm:$0xff] %v1037_v62 }
 0x311   :  { %1375 = vst [vmem:[%s2978_s7 + $0x278] sm:$0xff] %v1039_v45  ;;  %v1042_v40 = vpop.f32.mrb[70].mxu0 }
 0x312   :  { %v1043_v2 = vadd.f32 %v1042_v40, %v2581_v14  ;;  %v1044_v38 = vpop.f32.mrb[71].mxu0 }
 0x313   :  { %v1045_v15 = vadd.f32 %v1044_v38, %v2583_v10 }
 0x314   :  { %1377 = vst [vmem:[%s2978_s7 + $0x288] sm:$0xff] %v1043_v2 }
 0x315   :  { %1378 = vst [vmem:[%s2978_s7 + $0x290] sm:$0xff] %v1045_v15  ;;  %v1048_v19 = vpop.f32.mrb[72].mxu0 }
 0x316   :  { %v1049_v59 = vadd.f32 %v1048_v19, %v2581_v14  ;;  %v1050_v5 = vpop.f32.mrb[73].mxu0 }
 0x317   :  { %v1051_v32 = vadd.f32 %v1050_v5, %v2583_v10 }
 0x318   :  { %1380 = vst [vmem:[%s2978_s7 + $0x2a0] sm:$0xff] %v1049_v59 }
 0x319   :  { %1381 = vst [vmem:[%s2978_s7 + $0x2a8] sm:$0xff] %v1051_v32  ;;  %v1054_v50 = vpop.f32.mrb[74].mxu0 }
 0x31a   :  { %v1055_v21 = vadd.f32 %v1054_v50, %v2581_v14  ;;  %v1056_v54 = vpop.f32.mrb[75].mxu0 }
 0x31b   :  { %v1057_v56 = vadd.f32 %v1056_v54, %v2583_v10 }
 0x31c   :  { %1383 = vst [vmem:[%s2978_s7 + $0x2b8] sm:$0xff] %v1055_v21 }
 0x31d   :  { %1384 = vst [vmem:[%s2978_s7 + $0x2c0] sm:$0xff] %v1057_v56  ;;  %v1060_v1 = vpop.f32.mrb[76].mxu0 }
 0x31e   :  { %v1061_v18 = vadd.f32 %v1060_v1, %v2581_v14  ;;  %v1062_v44 = vpop.f32.mrb[77].mxu0 }
 0x31f   :  { %v1063_v13 = vadd.f32 %v1062_v44, %v2583_v10 }
 0x320   :  { %1386 = vst [vmem:[%s2978_s7 + $0x2d0] sm:$0xff] %v1061_v18 }
 0x321   :  { %1387 = vst [vmem:[%s2978_s7 + $0x2d8] sm:$0xff] %v1063_v13  ;;  %v1066_v17 = vpop.f32.mrb[78].mxu0 }
 0x322   :  { %v1067_v35 = vadd.f32 %v1066_v17, %v2581_v14  ;;  %v1068_v42 = vpop.f32.mrb[79].mxu0 }
 0x323   :  { %v1069_v46 = vadd.f32 %v1068_v42, %v2583_v10 }
 0x324   :  { %1389 = vst [vmem:[%s2978_s7 + $0x2e8] sm:$0xff] %v1067_v35 }
 0x325   :  { %1390 = vst [vmem:[%s2978_s7 + $0x2f0] sm:$0xff] %v1069_v46 }
 0x326   :  { %1396 = vsyncpa [#allocation3], 1 }

</bundles_post_ra>
